<compile_context>
chip_gen: v6e
topology: v6e:2x2x1
jax: 0.10.0
libtpu: 0.0.40
codegen_flags: <defaults>
</compile_context>

<pallas_src>
import functools

import jax
import jax.numpy as jnp
from jax import lax
from jax.experimental import pallas as pl
from jax.experimental.pallas import tpu as pltpu

L = 128        # hidden width hard-coded in the module
H1 = 2 * L     # 256: first hidden width of every branch


def samil_kernel(x_ref, w1c_ref, b1c_ref,
                 mm_w2_ref, mm_b2_ref, mm_w3_ref,
                 q_w2_ref, q_b2_ref,
                 v_w2_ref, v_b2_ref,
                 ws_w_ref, scal_ref,
                 o_ref):
    """One grid step = full SelfAttentionMIL forward for Bt bags.

    scal_ref (SMEM, f32[5]) = [maxmil_b3, wsi_b, cls_w0, cls_w1, cls_b].
    """
    Bt, N, D = x_ref.shape
    cdt = w1c_ref.dtype                                   # matmul operand dtype (bf16 or f32)

    # ---- fused first Linear(D,256) of maxmil/queries/visu: one (Bt*N,D)x(D,768) MXU pass ----
    x2 = x_ref[...].reshape(Bt * N, D)
    h1 = jnp.dot(x2, w1c_ref[...], preferred_element_type=jnp.float32)
    h1 = jnp.maximum(h1 + b1c_ref[...], 0.0)              # (Bt*N, 768) f32; Dropout = id (eval)
    h1 = h1.astype(cdt)                                   # back to MXU dtype for layer 2

    # ---- second Linear of each branch (plain 2-D MXU matmuls, f32 accumulation) ----
    h2 = jnp.dot(h1[:, 0:H1], mm_w2_ref[...], preferred_element_type=jnp.float32)
    h2 = jnp.maximum(h2 + mm_b2_ref[...], 0.0)            # (Bt*N, L) f32 (maxmil hidden)
    queries = (jnp.dot(h1[:, H1:2 * H1], q_w2_ref[...], preferred_element_type=jnp.float32)
               + q_b2_ref[...])                           # (Bt*N, L) f32
    visu = (jnp.dot(h1[:, 2 * H1:3 * H1], v_w2_ref[...], preferred_element_type=jnp.float32)
            + v_b2_ref[...])                              # (Bt*N, L) f32

    h2r = h2.reshape(Bt, N, L)
    q3 = queries.reshape(Bt, N, L)
    v3 = visu.reshape(Bt, N, L)

    # ---- maxmil instance scores, lane-dense (Bt,1,N), via batched MXU matvec ----
    w3b = jnp.broadcast_to(mm_w3_ref[...], (Bt, 1, L))    # tiny, hoisted per step
    mil = (jnp.einsum('bql,bnl->bqn', w3b, h2r, preferred_element_type=jnp.float32)
           + scal_ref[0])                                 # (Bt, 1, N) f32

    # ---- per-bag max + first-argmax one-hot; gather the max query on the MXU ----
    max_s = jnp.max(mil, axis=-1, keepdims=True)          # (Bt, 1, 1)
    iota = lax.broadcasted_iota(jnp.int32, (Bt, 1, N), 2)
    first_idx = jnp.min(jnp.where(mil == max_s, iota, N), axis=-1, keepdims=True)
    onehot = (iota == first_idx).astype(jnp.float32)      # (Bt, 1, N)
    max_query = jnp.einsum('bqn,bnl->bql', onehot, q3,
                           preferred_element_type=jnp.float32)     # (Bt, 1, L)

    # ---- self-attention scores + softmax over instances (lane axis), f32 ----
    sa = jnp.einsum('bql,bnl->bqn', max_query, q3,
                    preferred_element_type=jnp.float32)   # (Bt, 1, N)
    sa = sa - jnp.max(sa, axis=-1, keepdims=True)
    p = jnp.exp(sa)
    sa_w = p * pl.reciprocal(jnp.sum(p, axis=-1, keepdims=True))   # EUP reciprocal (exact)

    # ---- attention-weighted visu + wsi score + classifier Linear(2,1)+Sigmoid ----
    wvisu = jnp.einsum('bqn,bnl->bql', sa_w, v3,
                       preferred_element_type=jnp.float32)         # (Bt, 1, L)
    wsi = jnp.sum(wvisu * ws_w_ref[...], axis=-1, keepdims=True) + scal_ref[1]   # (Bt,1,1)
    logit = scal_ref[2] * max_s + scal_ref[3] * wsi + scal_ref[4]                # (Bt,1,1)
    o_ref[...] = pl.reciprocal(1.0 + jnp.exp(-logit))     # sigmoid via EUP reciprocal


def prepare_params(P, matmul_dtype=jnp.bfloat16):
    """One-time (param-load) folding: transpose to (in,out), concatenate the three first-layer
    weights, cast MXU operands to `matmul_dtype`, keep biases / score-path vectors in f32,
    pack the tiny scalars for SMEM."""
    p = {k: jnp.asarray(v, jnp.float32) for k, v in P.items()}
    w1c = jnp.concatenate([p["mm_w1"].T, p["q_w1"].T, p["v_w1"].T], axis=1)     # (D, 768)
    b1c = jnp.concatenate([p["mm_b1"], p["q_b1"], p["v_b1"]]).reshape(1, 3 * H1)
    scal = jnp.stack([p["mm_b3"][0], p["ws_b"][0],
                      p["c_w"][0, 0], p["c_w"][0, 1], p["c_b"][0]])
    return dict(
        w1c=w1c.astype(matmul_dtype), b1c=b1c,
        mm_w2=p["mm_w2"].T.astype(matmul_dtype), mm_b2=p["mm_b2"].reshape(1, L),
        mm_w3=p["mm_w3"].reshape(1, L),                      # f32: score path stays exact
        q_w2=p["q_w2"].T.astype(matmul_dtype), q_b2=p["q_b2"].reshape(1, L),
        v_w2=p["v_w2"].T.astype(matmul_dtype), v_b2=p["v_b2"].reshape(1, L),
        ws_w=p["ws_w"].reshape(1, L),
        scal=scal,
    )


@functools.partial(jax.jit, static_argnames=("bags_per_step",))
def self_attention_mil_forward(x, prep, bags_per_step=8):
    B, N, D = x.shape
    Bt = min(bags_per_step, B)
    Bp = -(-B // Bt) * Bt                       # pad B up to a multiple of Bt
    xk = x.astype(prep["w1c"].dtype)            # bf16 (or f32) HBM stream
    if Bp != B:
        xk = jnp.pad(xk, ((0, Bp - B), (0, 0), (0, 0)))
    n_steps = Bp // Bt
    fixed = lambda g: (0, 0)                    # weights resident across the whole grid

    out = pl.pallas_call(
        samil_kernel,
        out_shape=jax.ShapeDtypeStruct((Bp, 1, 1), jnp.float32),
        grid=(n_steps,),
        in_specs=[
            pl.BlockSpec((Bt, N, D), lambda g: (g, 0, 0)),       # Bt bags per grid step
            pl.BlockSpec((D, 3 * H1), fixed),                    # concat'd first-layer weights
            pl.BlockSpec((1, 3 * H1), fixed),                    # concat'd first-layer biases
            pl.BlockSpec((H1, L), fixed),                        # maxmil W2
            pl.BlockSpec((1, L), fixed),                         # maxmil b2
            pl.BlockSpec((1, L), fixed),                         # maxmil W3 (row vector, f32)
            pl.BlockSpec((H1, L), fixed),                        # queries W2
            pl.BlockSpec((1, L), fixed),                         # queries b2
            pl.BlockSpec((H1, L), fixed),                        # visu W2
            pl.BlockSpec((1, L), fixed),                         # visu b2
            pl.BlockSpec((1, L), fixed),                         # wsi_score W (row vector, f32)
            pl.BlockSpec(memory_space=pltpu.MemorySpace.SMEM),   # packed scalars
        ],
        out_specs=pl.BlockSpec((Bt, 1, 1), lambda g: (g, 0, 0)),
        compiler_params=pltpu.CompilerParams(
            dimension_semantics=("parallel",),                   # bag groups independent
            vmem_limit_bytes=32 * 1024 * 1024),
    )(xk, prep["w1c"], prep["b1c"],
      prep["mm_w2"], prep["mm_b2"], prep["mm_w3"],
      prep["q_w2"], prep["q_b2"],
      prep["v_w2"], prep["v_b2"],
      prep["ws_w"], prep["scal"])
    return out.reshape(Bp)[:B]


def reference_forward(x, P):
    """Pure-JAX eval-mode reference (PyTorch weight layout)."""
    relu = lambda v: jnp.maximum(v, 0.0)
    lin = lambda h, w, b: h @ w.T + b
    mil = lin(relu(lin(relu(lin(x, P["mm_w1"], P["mm_b1"])),
                       P["mm_w2"], P["mm_b2"])), P["mm_w3"], P["mm_b3"])     # (B,N,1)
    q = lin(relu(lin(x, P["q_w1"], P["q_b1"])), P["q_w2"], P["q_b2"])        # (B,N,L)
    v = lin(relu(lin(x, P["v_w1"], P["v_b1"])), P["v_w2"], P["v_b2"])        # (B,N,L)
    max_scores = jnp.max(mil, axis=1)                                        # (B,1)
    max_idx = jnp.argmax(mil[..., 0], axis=1)                                # (B,)
    max_query = q[jnp.arange(x.shape[0]), max_idx]                           # (B,L)
    sa = jnp.einsum("bnk,bk->bn", q, max_query)                              # (B,N)
    sa = jax.nn.softmax(sa, axis=-1)
    weighted = jnp.einsum("bn,bnk->bk", sa, v)                               # (B,L)
    wsi = weighted @ P["ws_w"].T + P["ws_b"]                                 # (B,1)
    fused = jnp.concatenate([max_scores, wsi], axis=-1)                      # (B,2)
    logit = fused @ P["c_w"].T + P["c_b"]                                    # (B,1)
    return jax.nn.sigmoid(logit)[:, 0]                                       # (B,)


if __name__ == "__main__":
    B, N, D = 2, 64, 32      # bags, instances per bag, feature_depth
    key = jax.random.PRNGKey(0)
    keys = jax.random.split(key, 20)

    def lin_init(kw, kb, out_dim, in_dim, scale=0.1):
        w = scale * jax.random.normal(kw, (out_dim, in_dim), dtype=jnp.float32)
        b = scale * jax.random.normal(kb, (out_dim,), dtype=jnp.float32)
        return w, b

    P = {}
    P["mm_w1"], P["mm_b1"] = lin_init(keys[0], keys[1], H1, D)    # maxmil: Linear(D,256)
    P["mm_w2"], P["mm_b2"] = lin_init(keys[2], keys[3], L, H1)    #         Linear(256,128)
    P["mm_w3"], P["mm_b3"] = lin_init(keys[4], keys[5], 1, L)     #         Linear(128,1)
    P["q_w1"], P["q_b1"] = lin_init(keys[6], keys[7], H1, D)      # queries: Linear(D,256)
    P["q_w2"], P["q_b2"] = lin_init(keys[8], keys[9], L, H1)      #          Linear(256,128)
    P["v_w1"], P["v_b1"] = lin_init(keys[10], keys[11], H1, D)    # visu:    Linear(D,256)
    P["v_w2"], P["v_b2"] = lin_init(keys[12], keys[13], L, H1)    #          Linear(256,128)
    P["ws_w"], P["ws_b"] = lin_init(keys[14], keys[15], 1, L)     # wsi_score: Linear(128,1)
    P["c_w"], P["c_b"] = lin_init(keys[16], keys[17], 1, 2)       # classifier: Linear(2,1)

    x = jax.random.normal(keys[18], (B, N, D), dtype=jnp.float32)
    ref = reference_forward(x, P)

    # 1) f32 operands: semantics check (tolerance covers MXU default-precision f32 matmuls).
    prep_f32 = prepare_params(P, matmul_dtype=jnp.float32)
    out_f32 = jax.block_until_ready(self_attention_mil_forward(x, prep_f32))
    assert out_f32.shape == (B,), out_f32.shape
    assert bool(jnp.all(jnp.isfinite(out_f32)))
    assert jnp.allclose(out_f32, ref, atol=1e-3, rtol=1e-3), (out_f32, ref)

    # 2) performance path: bf16 MXU operands, f32 accumulation + f32 score/softmax path.
    prep_bf16 = prepare_params(P, matmul_dtype=jnp.bfloat16)
    out_bf16 = jax.block_until_ready(self_attention_mil_forward(x, prep_bf16))
    assert out_bf16.shape == (B,), out_bf16.shape
    assert bool(jnp.all(jnp.isfinite(out_bf16)))
    assert jnp.allclose(out_bf16, ref, atol=2e-2, rtol=2e-2), (out_bf16, ref)

    # 3) uneven B exercising the pad-to-Bt path with a smaller bag-batch.
    x2 = jax.random.normal(keys[19], (3, 48, D), dtype=jnp.float32)
    ref2 = reference_forward(x2, P)
    out2 = jax.block_until_ready(
        self_attention_mil_forward(x2, prep_bf16, bags_per_step=2))
    assert out2.shape == (3,), out2.shape
    assert jnp.allclose(out2, ref2, atol=2e-2, rtol=2e-2), (out2, ref2)

    print("KERNEL_OK")
</pallas_src>

<mosaic_0001>
module attributes {stable_mosaic.version = 11 : i64} {
  func.func @samil_kernel(%arg0: i32, %arg1: memref<2x64x32xf32, #tpu.memory_space<vmem>>, %arg2: memref<32x768xf32, #tpu.memory_space<vmem>>, %arg3: memref<1x768xf32, #tpu.memory_space<vmem>>, %arg4: memref<256x128xf32, #tpu.memory_space<vmem>>, %arg5: memref<1x128xf32, #tpu.memory_space<vmem>>, %arg6: memref<1x128xf32, #tpu.memory_space<vmem>>, %arg7: memref<256x128xf32, #tpu.memory_space<vmem>>, %arg8: memref<1x128xf32, #tpu.memory_space<vmem>>, %arg9: memref<256x128xf32, #tpu.memory_space<vmem>>, %arg10: memref<1x128xf32, #tpu.memory_space<vmem>>, %arg11: memref<1x128xf32, #tpu.memory_space<vmem>>, %arg12: memref<5xf32, #tpu.memory_space<smem>>, %arg13: memref<2x1x1xf32, #tpu.memory_space<vmem>>) attributes {dimension_semantics = [#tpu.dimension_semantics<parallel>], iteration_bounds = array<i64: 1>, scalar_prefetch = 0 : i64, scratch_operands = 0 : i64, tpu.core_type = #tpu.core_type<tc>, window_params = [{transform_indices = @transform_0, window_bounds = array<i64: 2, 64, 32>}, {pipeline_mode = #tpu.pipeline_mode<synchronous>, transform_indices = @transform_1, window_bounds = array<i64: 32, 768>}, {pipeline_mode = #tpu.pipeline_mode<synchronous>, transform_indices = @transform_2, window_bounds = array<i64: 1, 768>}, {pipeline_mode = #tpu.pipeline_mode<synchronous>, transform_indices = @transform_3, window_bounds = array<i64: 256, 128>}, {pipeline_mode = #tpu.pipeline_mode<synchronous>, transform_indices = @transform_4, window_bounds = array<i64: 1, 128>}, {pipeline_mode = #tpu.pipeline_mode<synchronous>, transform_indices = @transform_5, window_bounds = array<i64: 1, 128>}, {pipeline_mode = #tpu.pipeline_mode<synchronous>, transform_indices = @transform_6, window_bounds = array<i64: 256, 128>}, {pipeline_mode = #tpu.pipeline_mode<synchronous>, transform_indices = @transform_7, window_bounds = array<i64: 1, 128>}, {pipeline_mode = #tpu.pipeline_mode<synchronous>, transform_indices = @transform_8, window_bounds = array<i64: 256, 128>}, {pipeline_mode = #tpu.pipeline_mode<synchronous>, transform_indices = @transform_9, window_bounds = array<i64: 1, 128>}, {pipeline_mode = #tpu.pipeline_mode<synchronous>, transform_indices = @transform_10, window_bounds = array<i64: 1, 128>}, {transform_indices = @transform_11, window_bounds = array<i64: 5>}, {transform_indices = @transform_12, window_bounds = array<i64: 2, 1, 1>}]} {
    %c0 = arith.constant 0 : index
    %c0_0 = arith.constant 0 : index
    %c0_1 = arith.constant 0 : index
    %0 = vector.load %arg1[%c0, %c0_0, %c0_1] : memref<2x64x32xf32, #tpu.memory_space<vmem>>, vector<2x64x32xf32>
    %1 = vector.shape_cast %0 : vector<2x64x32xf32> to vector<128x32xf32>
    %c0_2 = arith.constant 0 : index
    %c0_3 = arith.constant 0 : index
    %2 = vector.load %arg2[%c0_2, %c0_3] : memref<32x768xf32, #tpu.memory_space<vmem>>, vector<32x768xf32>
    %cst = arith.constant dense<0.000000e+00> : vector<128x768xf32>
    %3 = tpu.matmul %1, %2, %cst {dimension_numbers = #tpu.dot_dimension_numbers<[1], [0], [0], [1], [0, 0, 1, 1], [], []>} : vector<128x32xf32>, vector<32x768xf32>, vector<128x768xf32> -> vector<128x768xf32>
    %c0_4 = arith.constant 0 : index
    %c0_5 = arith.constant 0 : index
    %4 = vector.load %arg3[%c0_4, %c0_5] : memref<1x768xf32, #tpu.memory_space<vmem>>, vector<1x768xf32>
    %5 = vector.broadcast %4 : vector<1x768xf32> to vector<128x768xf32>
    %6 = arith.addf %3, %5 : vector<128x768xf32>
    %cst_6 = arith.constant 0.000000e+00 : f32
    %7 = vector.broadcast %cst_6 : f32 to vector<128x768xf32>
    %8 = arith.maximumf %6, %7 : vector<128x768xf32>
    %9 = vector.extract_strided_slice %8 {offsets = [0, 0], sizes = [128, 256], strides = [1, 1]} : vector<128x768xf32> to vector<128x256xf32>
    %c0_7 = arith.constant 0 : index
    %c0_8 = arith.constant 0 : index
    %10 = vector.load %arg4[%c0_7, %c0_8] : memref<256x128xf32, #tpu.memory_space<vmem>>, vector<256x128xf32>
    %cst_9 = arith.constant dense<0.000000e+00> : vector<128x128xf32>
    %11 = tpu.matmul %9, %10, %cst_9 {dimension_numbers = #tpu.dot_dimension_numbers<[1], [0], [0], [1], [0, 0, 1, 1], [], []>} : vector<128x256xf32>, vector<256x128xf32>, vector<128x128xf32> -> vector<128x128xf32>
    %c0_10 = arith.constant 0 : index
    %c0_11 = arith.constant 0 : index
    %12 = vector.load %arg5[%c0_10, %c0_11] : memref<1x128xf32, #tpu.memory_space<vmem>>, vector<1x128xf32>
    %13 = vector.broadcast %12 : vector<1x128xf32> to vector<128x128xf32>
    %14 = arith.addf %11, %13 : vector<128x128xf32>
    %cst_12 = arith.constant 0.000000e+00 : f32
    %15 = vector.broadcast %cst_12 : f32 to vector<128x128xf32>
    %16 = arith.maximumf %14, %15 : vector<128x128xf32>
    %17 = vector.extract_strided_slice %8 {offsets = [0, 256], sizes = [128, 256], strides = [1, 1]} : vector<128x768xf32> to vector<128x256xf32>
    %c0_13 = arith.constant 0 : index
    %c0_14 = arith.constant 0 : index
    %18 = vector.load %arg7[%c0_13, %c0_14] : memref<256x128xf32, #tpu.memory_space<vmem>>, vector<256x128xf32>
    %cst_15 = arith.constant dense<0.000000e+00> : vector<128x128xf32>
    %19 = tpu.matmul %17, %18, %cst_15 {dimension_numbers = #tpu.dot_dimension_numbers<[1], [0], [0], [1], [0, 0, 1, 1], [], []>} : vector<128x256xf32>, vector<256x128xf32>, vector<128x128xf32> -> vector<128x128xf32>
    %c0_16 = arith.constant 0 : index
    %c0_17 = arith.constant 0 : index
    %20 = vector.load %arg8[%c0_16, %c0_17] : memref<1x128xf32, #tpu.memory_space<vmem>>, vector<1x128xf32>
    %21 = vector.broadcast %20 : vector<1x128xf32> to vector<128x128xf32>
    %22 = arith.addf %19, %21 : vector<128x128xf32>
    %23 = vector.extract_strided_slice %8 {offsets = [0, 512], sizes = [128, 256], strides = [1, 1]} : vector<128x768xf32> to vector<128x256xf32>
    %c0_18 = arith.constant 0 : index
    %c0_19 = arith.constant 0 : index
    %24 = vector.load %arg9[%c0_18, %c0_19] : memref<256x128xf32, #tpu.memory_space<vmem>>, vector<256x128xf32>
    %cst_20 = arith.constant dense<0.000000e+00> : vector<128x128xf32>
    %25 = tpu.matmul %23, %24, %cst_20 {dimension_numbers = #tpu.dot_dimension_numbers<[1], [0], [0], [1], [0, 0, 1, 1], [], []>} : vector<128x256xf32>, vector<256x128xf32>, vector<128x128xf32> -> vector<128x128xf32>
    %c0_21 = arith.constant 0 : index
    %c0_22 = arith.constant 0 : index
    %26 = vector.load %arg10[%c0_21, %c0_22] : memref<1x128xf32, #tpu.memory_space<vmem>>, vector<1x128xf32>
    %27 = vector.broadcast %26 : vector<1x128xf32> to vector<128x128xf32>
    %28 = arith.addf %25, %27 : vector<128x128xf32>
    %29 = vector.shape_cast %16 : vector<128x128xf32> to vector<2x64x128xf32>
    %30 = vector.shape_cast %22 : vector<128x128xf32> to vector<2x64x128xf32>
    %31 = vector.shape_cast %28 : vector<128x128xf32> to vector<2x64x128xf32>
    %c0_23 = arith.constant 0 : index
    %c0_24 = arith.constant 0 : index
    %32 = vector.load %arg6[%c0_23, %c0_24] : memref<1x128xf32, #tpu.memory_space<vmem>>, vector<1x128xf32>
    %33 = vector.shape_cast %32 : vector<1x128xf32> to vector<1x1x128xf32>
    %34 = vector.broadcast %33 : vector<1x1x128xf32> to vector<2x1x128xf32>
    "tpu.trace_start"() <{level = 10 : i32, message = "bql,bnl->bqn"}> : () -> ()
    %cst_25 = arith.constant dense<0.000000e+00> : vector<2x1x64xf32>
    %35 = tpu.matmul %34, %29, %cst_25 {dimension_numbers = #tpu.dot_dimension_numbers<[2], [2], [1], [1], [0, 0, 0, 1, 1, 1], [0], [0]>} : vector<2x1x128xf32>, vector<2x64x128xf32>, vector<2x1x64xf32> -> vector<2x1x64xf32>
    "tpu.trace_stop"() : () -> ()
    %c0_26 = arith.constant 0 : index
    %36 = memref.load %arg12[%c0_26] : memref<5xf32, #tpu.memory_space<smem>>
    %37 = vector.broadcast %36 : f32 to vector<2x1x64xf32>
    %38 = arith.addf %35, %37 : vector<2x1x64xf32>
    %cst_27 = arith.constant dense<0xFF800000> : vector<2x1xf32>
    %39 = vector.multi_reduction <maximumf>, %38, %cst_27 [2] : vector<2x1x64xf32> to vector<2x1xf32>
    %40 = vector.shape_cast %39 : vector<2x1xf32> to vector<2x1x1xf32>
    %41 = tpu.iota {dimensions = array<i32: 2>} : vector<2x1x64xi32>
    %42 = vector.broadcast %40 : vector<2x1x1xf32> to vector<2x1x64xf32>
    %43 = arith.cmpf oeq, %38, %42 : vector<2x1x64xf32>
    %c64_i32 = arith.constant 64 : i32
    %44 = vector.broadcast %c64_i32 : i32 to vector<2x1x64xi32>
    %45 = arith.select %43, %41, %44 : vector<2x1x64xi1>, vector<2x1x64xi32>
    %cst_28 = arith.constant dense<2147483647> : vector<2x1xi32>
    %46 = vector.multi_reduction <minsi>, %45, %cst_28 [2] : vector<2x1x64xi32> to vector<2x1xi32>
    %47 = vector.shape_cast %46 : vector<2x1xi32> to vector<2x1x1xi32>
    %48 = vector.broadcast %47 : vector<2x1x1xi32> to vector<2x1x64xi32>
    %49 = arith.cmpi eq, %41, %48 : vector<2x1x64xi32>
    %50 = arith.extui %49 : vector<2x1x64xi1> to vector<2x1x64xi32>
    %51 = arith.sitofp %50 : vector<2x1x64xi32> to vector<2x1x64xf32>
    "tpu.trace_start"() <{level = 10 : i32, message = "bqn,bnl->bql"}> : () -> ()
    %cst_29 = arith.constant dense<0.000000e+00> : vector<2x1x128xf32>
    %52 = tpu.matmul %51, %30, %cst_29 {dimension_numbers = #tpu.dot_dimension_numbers<[2], [1], [1], [2], [0, 0, 0, 1, 1, 2], [0], [0]>} : vector<2x1x64xf32>, vector<2x64x128xf32>, vector<2x1x128xf32> -> vector<2x1x128xf32>
    "tpu.trace_stop"() : () -> ()
    "tpu.trace_start"() <{level = 10 : i32, message = "bql,bnl->bqn"}> : () -> ()
    %cst_30 = arith.constant dense<0.000000e+00> : vector<2x1x64xf32>
    %53 = tpu.matmul %52, %30, %cst_30 {dimension_numbers = #tpu.dot_dimension_numbers<[2], [2], [1], [1], [0, 0, 0, 1, 1, 1], [0], [0]>} : vector<2x1x128xf32>, vector<2x64x128xf32>, vector<2x1x64xf32> -> vector<2x1x64xf32>
    "tpu.trace_stop"() : () -> ()
    %cst_31 = arith.constant dense<0xFF800000> : vector<2x1xf32>
    %54 = vector.multi_reduction <maximumf>, %53, %cst_31 [2] : vector<2x1x64xf32> to vector<2x1xf32>
    %55 = vector.shape_cast %54 : vector<2x1xf32> to vector<2x1x1xf32>
    %56 = vector.broadcast %55 : vector<2x1x1xf32> to vector<2x1x64xf32>
    %57 = arith.subf %53, %56 : vector<2x1x64xf32>
    %58 = math.exp %57 : vector<2x1x64xf32>
    %cst_32 = arith.constant dense<0.000000e+00> : vector<2x1xf32>
    %59 = vector.multi_reduction <add>, %58, %cst_32 [2] : vector<2x1x64xf32> to vector<2x1xf32>
    %60 = vector.shape_cast %59 : vector<2x1xf32> to vector<2x1x1xf32>
    %61 = tpu.reciprocal %60 : vector<2x1x1xf32> -> vector<2x1x1xf32>
    %62 = vector.broadcast %61 : vector<2x1x1xf32> to vector<2x1x64xf32>
    %63 = arith.mulf %58, %62 : vector<2x1x64xf32>
    "tpu.trace_start"() <{level = 10 : i32, message = "bqn,bnl->bql"}> : () -> ()
    %cst_33 = arith.constant dense<0.000000e+00> : vector<2x1x128xf32>
    %64 = tpu.matmul %63, %31, %cst_33 {dimension_numbers = #tpu.dot_dimension_numbers<[2], [1], [1], [2], [0, 0, 0, 1, 1, 2], [0], [0]>} : vector<2x1x64xf32>, vector<2x64x128xf32>, vector<2x1x128xf32> -> vector<2x1x128xf32>
    "tpu.trace_stop"() : () -> ()
    %c0_34 = arith.constant 0 : index
    %c0_35 = arith.constant 0 : index
    %65 = vector.load %arg11[%c0_34, %c0_35] : memref<1x128xf32, #tpu.memory_space<vmem>>, vector<1x128xf32>
    %66 = vector.shape_cast %65 : vector<1x128xf32> to vector<1x1x128xf32>
    %67 = vector.broadcast %66 : vector<1x1x128xf32> to vector<2x1x128xf32>
    %68 = arith.mulf %64, %67 : vector<2x1x128xf32>
    %cst_36 = arith.constant dense<0.000000e+00> : vector<2x1xf32>
    %69 = vector.multi_reduction <add>, %68, %cst_36 [2] : vector<2x1x128xf32> to vector<2x1xf32>
    %70 = vector.shape_cast %69 : vector<2x1xf32> to vector<2x1x1xf32>
    %c1 = arith.constant 1 : index
    %71 = memref.load %arg12[%c1] : memref<5xf32, #tpu.memory_space<smem>>
    %72 = vector.broadcast %71 : f32 to vector<2x1x1xf32>
    %73 = arith.addf %70, %72 : vector<2x1x1xf32>
    %c2 = arith.constant 2 : index
    %74 = memref.load %arg12[%c2] : memref<5xf32, #tpu.memory_space<smem>>
    %75 = vector.broadcast %74 : f32 to vector<2x1x1xf32>
    %76 = arith.mulf %75, %40 : vector<2x1x1xf32>
    %c3 = arith.constant 3 : index
    %77 = memref.load %arg12[%c3] : memref<5xf32, #tpu.memory_space<smem>>
    %78 = vector.broadcast %77 : f32 to vector<2x1x1xf32>
    %79 = arith.mulf %78, %73 : vector<2x1x1xf32>
    %80 = arith.addf %76, %79 : vector<2x1x1xf32>
    %c4 = arith.constant 4 : index
    %81 = memref.load %arg12[%c4] : memref<5xf32, #tpu.memory_space<smem>>
    %82 = vector.broadcast %81 : f32 to vector<2x1x1xf32>
    %83 = arith.addf %80, %82 : vector<2x1x1xf32>
    %cst_37 = arith.constant 0.000000e+00 : f32
    %84 = vector.broadcast %cst_37 : f32 to vector<2x1x1xf32>
    %85 = arith.subf %84, %83 : vector<2x1x1xf32>
    %86 = math.exp %85 : vector<2x1x1xf32>
    %cst_38 = arith.constant 1.000000e+00 : f32
    %87 = vector.broadcast %cst_38 : f32 to vector<2x1x1xf32>
    %88 = arith.addf %87, %86 : vector<2x1x1xf32>
    %89 = tpu.reciprocal %88 : vector<2x1x1xf32> -> vector<2x1x1xf32>
    %c0_39 = arith.constant 0 : index
    %c0_40 = arith.constant 0 : index
    %c0_41 = arith.constant 0 : index
    %90 = vector.load %arg13[%c0_39, %c0_40, %c0_41] : memref<2x1x1xf32, #tpu.memory_space<vmem>>, vector<2x1x1xf32>
    tpu.vector_store %arg13[%c0_39, %c0_40, %c0_41], %89 {strides = array<i32>} : memref<2x1x1xf32, #tpu.memory_space<vmem>>, vector<2x1x1xf32>,
    return
  }
  func.func @transform_0(%arg0: i32) -> (i32, i32, i32) {
    %c0_i32 = arith.constant 0 : i32
    %c0_i32_0 = arith.constant 0 : i32
    %c0_i32_1 = arith.constant 0 : i32
    return %arg0, %c0_i32, %c0_i32_0 : i32, i32, i32
  }
  func.func @transform_1(%arg0: i32) -> (i32, i32) {
    %c0_i32 = arith.constant 0 : i32
    %c0_i32_0 = arith.constant 0 : i32
    %c0_i32_1 = arith.constant 0 : i32
    return %c0_i32, %c0_i32_0 : i32, i32
  }
  func.func @transform_2(%arg0: i32) -> (i32, i32) {
    %c0_i32 = arith.constant 0 : i32
    %c0_i32_0 = arith.constant 0 : i32
    %c0_i32_1 = arith.constant 0 : i32
    return %c0_i32, %c0_i32_0 : i32, i32
  }
  func.func @transform_3(%arg0: i32) -> (i32, i32) {
    %c0_i32 = arith.constant 0 : i32
    %c0_i32_0 = arith.constant 0 : i32
    %c0_i32_1 = arith.constant 0 : i32
    return %c0_i32, %c0_i32_0 : i32, i32
  }
  func.func @transform_4(%arg0: i32) -> (i32, i32) {
    %c0_i32 = arith.constant 0 : i32
    %c0_i32_0 = arith.constant 0 : i32
    %c0_i32_1 = arith.constant 0 : i32
    return %c0_i32, %c0_i32_0 : i32, i32
  }
  func.func @transform_5(%arg0: i32) -> (i32, i32) {
    %c0_i32 = arith.constant 0 : i32
    %c0_i32_0 = arith.constant 0 : i32
    %c0_i32_1 = arith.constant 0 : i32
    return %c0_i32, %c0_i32_0 : i32, i32
  }
  func.func @transform_6(%arg0: i32) -> (i32, i32) {
    %c0_i32 = arith.constant 0 : i32
    %c0_i32_0 = arith.constant 0 : i32
    %c0_i32_1 = arith.constant 0 : i32
    return %c0_i32, %c0_i32_0 : i32, i32
  }
  func.func @transform_7(%arg0: i32) -> (i32, i32) {
    %c0_i32 = arith.constant 0 : i32
    %c0_i32_0 = arith.constant 0 : i32
    %c0_i32_1 = arith.constant 0 : i32
    return %c0_i32, %c0_i32_0 : i32, i32
  }
  func.func @transform_8(%arg0: i32) -> (i32, i32) {
    %c0_i32 = arith.constant 0 : i32
    %c0_i32_0 = arith.constant 0 : i32
    %c0_i32_1 = arith.constant 0 : i32
    return %c0_i32, %c0_i32_0 : i32, i32
  }
  func.func @transform_9(%arg0: i32) -> (i32, i32) {
    %c0_i32 = arith.constant 0 : i32
    %c0_i32_0 = arith.constant 0 : i32
    %c0_i32_1 = arith.constant 0 : i32
    return %c0_i32, %c0_i32_0 : i32, i32
  }
  func.func @transform_10(%arg0: i32) -> (i32, i32) {
    %c0_i32 = arith.constant 0 : i32
    %c0_i32_0 = arith.constant 0 : i32
    %c0_i32_1 = arith.constant 0 : i32
    return %c0_i32, %c0_i32_0 : i32, i32
  }
  func.func @transform_11(%arg0: i32) -> i32 {
    %c0_i32 = arith.constant 0 : i32
    %c0_i32_0 = arith.constant 0 : i32
    return %c0_i32 : i32
  }
  func.func @transform_12(%arg0: i32) -> (i32, i32, i32) {
    %c0_i32 = arith.constant 0 : i32
    %c0_i32_0 = arith.constant 0 : i32
    %c0_i32_1 = arith.constant 0 : i32
    return %arg0, %c0_i32, %c0_i32_0 : i32, i32, i32
  }
}

</mosaic_0001>

<bundles_post_ra>
// kernel: self_attention_mil_forward.1
= control target key start
LH: loop header
LB: loop body
LE: loop exit
PB: predicated region body
PF: predicated region fallthrough
CT: control target
= control target key end

     0   :  { %17 = vsyncpa [#allocation3], 0  ;;  %s3581_s0 = inlined_call_operand.vmem [shape: f32[2,64,32], index: 0, kind: input, shape index: {}]   ;;  %s3582_s1 = inlined_call_operand.vmem [shape: f32[32,768], index: 1, kind: input, shape index: {}]   ;;  %s3583_s2 = inlined_call_operand.vmem [shape: f32[1,768], index: 2, kind: input, shape index: {}]   ;;  %s3584_s3 = inlined_call_operand.hbm [shape: f32[256,128], index: 3, kind: input, shape index: {}]   ;;  %s3585_s4 = inlined_call_operand.vmem [shape: f32[1,128], index: 4, kind: input, shape index: {}]   ;;  %s3586_s5 = inlined_call_operand.vmem [shape: f32[1,128], index: 5, kind: input, shape index: {}]   ;;  %s3587_s6 = inlined_call_operand.hbm [shape: f32[256,128], index: 6, kind: input, shape index: {}]   ;;  %s3588_s7 = inlined_call_operand.vmem [shape: f32[1,128], index: 7, kind: input, shape index: {}]   ;;  %s3589_s8 = inlined_call_operand.hbm [shape: f32[256,128], index: 8, kind: input, shape index: {}]   ;;  %s3590_s9 = inlined_call_operand.vmem [shape: f32[1,128], index: 9, kind: input, shape index: {}]   ;;  %s3591_s10 = inlined_call_operand.vmem [shape: f32[1,128], index: 10, kind: input, shape index: {}]   ;;  %s3592_s11 = inlined_call_operand.vmem [shape: f32[5], index: 11, kind: input, shape index: {}]   ;;  %s3593_s12 = inlined_call_operand.vmem [shape: f32[2,1,1], index: 12, kind: output, shape index: {}]  }
   0x1   :  { %18 = vsyncpa [#allocation6], 0 }
   0x2   :  { %19 = vsyncpa [#allocation4], 0  ;;  %s2685_s21 = smov [#allocation5]   ;;  %s2686_s23 = smov [#allocation2]  }
   0x3   :  { %s47_s22 = sshll.u32 %s2685_s21, 4  ;;  %s31_s24 = sshll.u32 %s2686_s23, 4  ;;  %s48_s22 = int_to_ptr.vmem [resolvable:$true] %s47_s22  ;;  %s32_s24 = int_to_ptr.vmem [resolvable:$true] %s31_s24 }
   0x4   :  { %s2615_s25 = scalar_lea.vmem %s48_s22, 4096  ;;  %p2620_p1 = scmp.lt.s32.totalorder %s48_s22, %s48_s22 }
   0x5   :  { %p2616_p0 = scmp.ne.s32.totalorder %s48_s22, %s2615_s25  ;;  %p2621_p2 = scmp.lt.s32.totalorder %s2615_s25, %s2615_s25 }
   0x7   :  { %p2622_p3 = por %p2621_p2, %p2620_p1 }
   0x9   :  { %p2623_p4 = pnand %p2622_p3, %p2616_p0 }
   0xb   :  { %2626 = shalt.err (!%p2623_p4)
}
   0xc   :  { %s2687_s26 = smov 128   ;;  %s2688_s27 = smov 8  }
   0xd   :  { %53 = dma.hbm_to_vmem [thread:$0]  %s3587_s6, 4096, %s48_s22, [#allocation6], %s2687_s26, %s2687_s26, %s2688_s27  }
   0xe   :  { %s2635_s30 = scalar_lea.vmem %s32_s24, 4096  ;;  %p2640_p6 = scmp.lt.s32.totalorder %s32_s24, %s32_s24 }
   0xf   :  { %p2636_p5 = scmp.ne.s32.totalorder %s32_s24, %s2635_s30  ;;  %p2641_p7 = scmp.lt.s32.totalorder %s2635_s30, %s2635_s30 }
  0x11   :  { %p2642_p8 = por %p2641_p7, %p2640_p6 }
  0x13   :  { %p2643_p9 = pnand %p2642_p8, %p2636_p5 }
  0x15   :  { %2646 = shalt.err (!%p2643_p9)
}
  0x16   :  { %37 = dma.hbm_to_vmem [thread:$0]  %s3584_s3, 4096, %s32_s24, [#allocation3], %s2687_s26, %s2687_s26, %s2688_s27  }
  0x17   :  { %s78_s17 = sshll.u32 %s3592_s11, 4  ;;  %s2689_s18 = smov [#allocation7]   ;;  %s79_s17 = int_to_ptr.vmem [resolvable:$true] %s78_s17 }
  0x18   :  { %s61_s19 = sshll.u32 %s2689_s18, 4  ;;  %s62_s19 = int_to_ptr.vmem [resolvable:$true] %s61_s19 }
  0x19   :  { %s2655_s6 = scalar_lea.vmem %s62_s19, 4096  ;;  %p2660_p11 = scmp.lt.s32.totalorder %s62_s19, %s62_s19 }
  0x1a   :  { %p2656_p10 = scmp.ne.s32.totalorder %s62_s19, %s2655_s6  ;;  %p2661_p12 = scmp.lt.s32.totalorder %s2655_s6, %s2655_s6 }
  0x1c   :  { %p2662_p13 = por %p2661_p12, %p2660_p11 }
  0x1e   :  { %p2663_p0 = pnand %p2662_p13, %p2656_p10 }
  0x20   :  { %2666 = shalt.err (!%p2663_p0)
}
  0x21   :  { %67 = dma.hbm_to_vmem [thread:$0]  %s3589_s8, 4096, %s62_s19, [#allocation6], %s2687_s26, %s2687_s26, %s2688_s27  }
  0x22   :  { %s2667_s3 = scalar_lea.vmem %s79_s17, 16  ;;  %p2672_p2 = scmp.lt.s32.totalorder %s79_s17, %s79_s17 }
  0x23   :  { %p2668_p1 = scmp.ne.s32.totalorder %s79_s17, %s2667_s3  ;;  %p2673_p3 = scmp.lt.s32.totalorder %s2667_s3, %s2667_s3 }
  0x25   :  { %p2674_p4 = por %p2673_p3, %p2672_p2 }
  0x27   :  { %p2675_p5 = pnand %p2674_p4, %p2668_p1 }
  0x29   :  { %2678 = shalt.err (!%p2675_p5)
}
  0x2a   :  { %s2690_s11 = smov [#allocation8]  }
  0x2b   :  { %81 = dma.vmem_to_smem %s79_s17, 16, %s2690_s11, [#allocation4]  }
  0x2c   :  { %2679 = dma.done.wait [#allocation3], 4096  }
  0x2d   :  { %2680 = vsyncadd [#allocation3], 4294963200 }
  0x2e   :  { %2681 = dma.done.wait [#allocation6], 8192  }
  0x2f   :  { %2682 = vsyncadd [#allocation6], 4294959104 }
  0x30   :  { %2683 = dma.done.wait [#allocation4], 16  }
  0x31   :  { %2684 = vsyncadd [#allocation4], 4294967280 }
  0x32   :  { %94 = sfence }
  0x33   :  { %v130_v0 = vld [vmem:[%s3582_s1 + $0x98] sm:$0xff]  ;;  %v129_v1 = vld [vmem:[%s3582_s1 + $0x90] sm:$0xff]  ;;  %v124_v2 = vld [vmem:[%s3582_s1 + $0x68] sm:$0xff]  ;;  %v2691_v4 = vmov 0.0   ;;  %vm167_vm0 = vcmask 261120   ;;  %vm2692_vm1 = vmmov 0  }
  0x34   :  { %240 = vmatprep.subr.mxu0 %v130_v0  ;;  %v123_v3 = vld [vmem:[%s3582_s1 + $0x60] sm:$0xff]  ;;  %280 = vmatprep.mubr.f32.mxu0 %v2691_v4  ;;  %v118_v5 = vld [vmem:[%s3582_s1 + $0x38] sm:$0xff]  ;;  %v117_v6 = vld [vmem:[%s3582_s1 + $0x30] sm:$0xff]  ;;  %vm1506_vm2 = vcmask 516096   ;;  %vm1555_vm7 = vcmask 523264   ;;  %vm2013_vm10 = vcmask 1040384  }
  0x35   :  { %241 = vmatpush1.msra.mxu0 %v129_v1  ;;  %441 = vmatprep.mubr.f32.mxu1 %v2691_v4  ;;  %v112_v7 = vld [vmem:[%s3582_s1 + $0x8] sm:$0xff]  ;;  %v111_v8 = vld [vmem:[%s3582_s1] sm:$0xff]  ;;  %v126_v12 = vld [vmem:[%s3582_s1 + $0x78] sm:$0xff]  ;;  %s2116_s3 = sld [smem:[#allocation8 + $0x2]]  ;;  %vm2048_vm11 = vcmask 0  }
  0x36   :  { %242 = vmatprep.subr.mxu0 %v124_v2  ;;  %v2799_v9 = vld [vmem:[%s3581_s0] sm:$0xff]  ;;  %v132_v10 = vld [vmem:[%s3582_s1 + $0xa8] sm:$0xff]  ;;  %v125_v13 = vld [vmem:[%s3582_s1 + $0x70] sm:$0xff]  ;;  %s2117_s11 = sld [smem:[#allocation8 + $0x3]] }
  0x37   :  { %243 = vmatpush1.msra.mxu0 %v123_v3  ;;  %v131_v11 = vld [vmem:[%s3582_s1 + $0xa0] sm:$0xff]  ;;  %401 = vmatprep.subr.mxu1 %v132_v10  ;;  %v2819_v14 = vld [vmem:[%s3581_s0 + $0x8] sm:$0xff]  ;;  %v114_v17 = vld [vmem:[%s3582_s1 + $0x18] sm:$0xff]  ;;  %s2118_s22 = sld [smem:[#allocation8 + $0x4]] }
  0x38   :  { %244 = vmatprep.subr.mxu0 %v118_v5  ;;  %402 = vmatpush1.msra.mxu1 %v131_v11  ;;  %v120_v15 = vld [vmem:[%s3582_s1 + $0x48] sm:$0xff]  ;;  %v119_v16 = vld [vmem:[%s3582_s1 + $0x40] sm:$0xff]  ;;  %v113_v18 = vld [vmem:[%s3582_s1 + $0x10] sm:$0xff] }
  0x39   :  { %245 = vmatpush1.msra.mxu0 %v117_v6  ;;  %403 = vmatprep.subr.mxu1 %v126_v12  ;;  %v2839_v19 = vld [vmem:[%s3581_s0 + $0x10] sm:$0xff]  ;;  %v826_v20 = vld [vmem:[#allocation2 + $0xf8] sm:$0xff]  ;;  %v2860_v25 = vld [vmem:[%s3581_s0 + $0x20] sm:$0xff] }
  0x3a   :  { %246 = vmatprep.subr.mxu0 %v112_v7  ;;  %404 = vmatpush1.msra.mxu1 %v125_v13  ;;  %v810_v21 = vld [vmem:[#allocation2 + $0x78] sm:$0xff]  ;;  %v825_v23 = vld [vmem:[#allocation2 + $0xf0] sm:$0xff]  ;;  %v824_v26 = vld [vmem:[#allocation2 + $0xe8] sm:$0xff] }
  0x3b   :  { %247 = vmatpush1.msra.mxu0 %v111_v8  ;;  %405 = vmatprep.subr.mxu1 %v120_v15  ;;  %v2849_v22 = vld [vmem:[%s3581_s0 + $0x18] sm:$0xff]  ;;  %v809_v24 = vld [vmem:[#allocation2 + $0x70] sm:$0xff]  ;;  %v808_v27 = vld [vmem:[#allocation2 + $0x68] sm:$0xff] }
  0x3c   :  { %2058 = vmatmul.mubr.msk.f32.vlgmr.msra.gmra.mxu0 %vm167_vm0, %v2799_v9  ;;  %406 = vmatpush1.msra.mxu1 %v119_v16  ;;  %v2871_v28 = vld [vmem:[%s3581_s0 + $0x28] sm:$0xff]  ;;  %v823_v29 = vld [vmem:[#allocation2 + $0xe0] sm:$0xff]  ;;  %v2882_v31 = vld [vmem:[%s3581_s0 + $0x30] sm:$0xff] }
  0x3d   :  { %286 = vmatprep.mubr.f32.mxu0 %v2691_v4  ;;  %407 = vmatprep.subr.mxu1 %v114_v17  ;;  %v807_v30 = vld [vmem:[#allocation2 + $0x60] sm:$0xff]  ;;  %v822_v32 = vld [vmem:[#allocation2 + $0xd8] sm:$0xff]  ;;  %v821_v35 = vld [vmem:[#allocation2 + $0xd0] sm:$0xff] }
  0x3e   :  { %408 = vmatpush1.msra.mxu1 %v113_v18  ;;  %v806_v33 = vld [vmem:[#allocation2 + $0x58] sm:$0xff]  ;;  %v805_v36 = vld [vmem:[#allocation2 + $0x50] sm:$0xff]  ;;  %v2904_v37 = vld [vmem:[%s3581_s0 + $0x40] sm:$0xff] }
  0x3f   :  { %2074 = vmatmul.mubr.msk.f32.vlgmr.msra.gmra.mxu1 %vm167_vm0, %v2799_v9  ;;  %2119 = vmatprep.subr.mxu1 %v826_v20  ;;  %v2893_v34 = vld [vmem:[%s3581_s0 + $0x38] sm:$0xff]  ;;  %v820_v38 = vld [vmem:[#allocation2 + $0xc8] sm:$0xff]  ;;  %v819_v41 = vld [vmem:[#allocation2 + $0xc0] sm:$0xff] }
  0x40   :  { %2059 = vmatmul.mubr.msk.f32.gmra.mxu0 %vm167_vm0, %v2819_v14  ;;  %447 = vmatprep.mubr.f32.mxu1 %v2691_v4  ;;  %v804_v39 = vld [vmem:[#allocation2 + $0x48] sm:$0xff]  ;;  %v803_v42 = vld [vmem:[#allocation2 + $0x40] sm:$0xff]  ;;  %v2926_v43 = vld [vmem:[%s3581_s0 + $0x50] sm:$0xff] }
  0x41   :  { %292 = vmatprep.mubr.f32.mxu0 %v2691_v4  ;;  %2120 = vmatpush3.msra.mxu1 %v810_v21  ;;  %v2915_v40 = vld [vmem:[%s3581_s0 + $0x48] sm:$0xff]  ;;  %v818_v44 = vld [vmem:[#allocation2 + $0xb8] sm:$0xff]  ;;  %v817_v47 = vld [vmem:[#allocation2 + $0xb0] sm:$0xff] }
  0x42   :  { %2121 = vmatprep.subr.mxu1 %v825_v23  ;;  %v802_v45 = vld [vmem:[#allocation2 + $0x38] sm:$0xff]  ;;  %v801_v48 = vld [vmem:[#allocation2 + $0x30] sm:$0xff]  ;;  %v2948_v49 = vld [vmem:[%s3581_s0 + $0x60] sm:$0xff] }
  0x43   :  { %2075 = vmatmul.mubr.msk.f32.gmra.mxu1 %vm167_vm0, %v2819_v14  ;;  %v2937_v46 = vld [vmem:[%s3581_s0 + $0x58] sm:$0xff]  ;;  %v816_v50 = vld [vmem:[#allocation2 + $0xa8] sm:$0xff]  ;;  %v815_v53 = vld [vmem:[#allocation2 + $0xa0] sm:$0xff] }
  0x44   :  { %2060 = vmatmul.mubr.msk.f32.gmra.mxu0 %vm167_vm0, %v2839_v19  ;;  %453 = vmatprep.mubr.f32.mxu1 %v2691_v4  ;;  %v800_v51 = vld [vmem:[#allocation2 + $0x28] sm:$0xff]  ;;  %v799_v54 = vld [vmem:[#allocation2 + $0x20] sm:$0xff]  ;;  %v2970_v55 = vld [vmem:[%s3581_s0 + $0x70] sm:$0xff] }
  0x45   :  { %298 = vmatprep.mubr.f32.mxu0 %v2691_v4  ;;  %2122 = vmatpush3.msra.mxu1 %v809_v24  ;;  %v2959_v52 = vld [vmem:[%s3581_s0 + $0x68] sm:$0xff]  ;;  %v2981_v56 = vld [vmem:[%s3581_s0 + $0x78] sm:$0xff]  ;;  %v813_v59 = vld [vmem:[#allocation2 + $0x90] sm:$0xff]  ;;  %s2115_s0 = sld [smem:[#allocation8 + $0x1]] }
  0x46   :  { %2123 = vmatprep.subr.mxu1 %v824_v26  ;;  %v814_v57 = vld [vmem:[#allocation2 + $0x98] sm:$0xff]  ;;  %v797_v60 = vld [vmem:[#allocation2 + $0x10] sm:$0xff]  ;;  %v812_v61 = vld [vmem:[#allocation2 + $0x88] sm:$0xff] }
  0x47   :  { %2076 = vmatmul.mubr.msk.f32.gmra.mxu1 %vm167_vm0, %v2839_v19  ;;  %v798_v58 = vld [vmem:[#allocation2 + $0x18] sm:$0xff]  ;;  %v796_v62 = vld [vmem:[#allocation2 + $0x8] sm:$0xff]  ;;  %v811_v63 = vld [vmem:[#allocation2 + $0x80] sm:$0xff] }
  0x48   :  { %2061 = vmatmul.mubr.msk.f32.gmra.mxu0 %vm167_vm0, %v2849_v22  ;;  %459 = vmatprep.mubr.f32.mxu1 %v2691_v4  ;;  %v795_v0 = vld [vmem:[#allocation2] sm:$0xff]  ;;  %v134_v1 = vld [vmem:[%s3582_s1 + $0xb8] sm:$0xff]  ;;  %v133_v2 = vld [vmem:[%s3582_s1 + $0xb0] sm:$0xff] }
  0x49   :  { %304 = vmatprep.mubr.f32.mxu0 %v2691_v4  ;;  %2124 = vmatpush3.msra.mxu1 %v808_v27  ;;  %v128_v3 = vld [vmem:[%s3582_s1 + $0x88] sm:$0xff]  ;;  %v127_v5 = vld [vmem:[%s3582_s1 + $0x80] sm:$0xff]  ;;  %v122_v6 = vld [vmem:[%s3582_s1 + $0x58] sm:$0xff] }
  0x4a   :  { %2125 = vmatprep.subr.mxu1 %v823_v29  ;;  %562 = vmatprep.subr.mxu0 %v134_v1  ;;  %v121_v7 = vld [vmem:[%s3582_s1 + $0x50] sm:$0xff]  ;;  %v116_v8 = vld [vmem:[%s3582_s1 + $0x28] sm:$0xff]  ;;  %v115_v10 = vld [vmem:[%s3582_s1 + $0x20] sm:$0xff] }
  0x4b   :  { %2077 = vmatmul.mubr.msk.f32.gmra.mxu1 %vm167_vm0, %v2849_v22  ;;  %563 = vmatpush1.msra.mxu0 %v133_v2  ;;  %v1010_v11 = vld [vmem:[#allocation5 + $0x78] sm:$0xff]  ;;  %v1025_v12 = vld [vmem:[#allocation5 + $0xf0] sm:$0xff]  ;;  %v1008_v15 = vld [vmem:[#allocation5 + $0x68] sm:$0xff] }
  0x4c   :  { %2062 = vmatmul.mubr.msk.f32.gmra.mxu0 %vm167_vm0, %v2860_v25  ;;  %465 = vmatprep.mubr.f32.mxu1 %v2691_v4  ;;  %v1009_v13 = vld [vmem:[#allocation5 + $0x70] sm:$0xff]  ;;  %v1023_v16 = vld [vmem:[#allocation5 + $0xe0] sm:$0xff]  ;;  %v1022_v18 = vld [vmem:[#allocation5 + $0xd8] sm:$0xff] }
  0x4d   :  { %310 = vmatprep.mubr.f32.mxu0 %v2691_v4  ;;  %2126 = vmatpush3.msra.mxu1 %v807_v30  ;;  %v1007_v17 = vld [vmem:[#allocation5 + $0x60] sm:$0xff]  ;;  %v1021_v20 = vld [vmem:[#allocation5 + $0xd0] sm:$0xff]  ;;  %v1004_v23 = vld [vmem:[#allocation5 + $0x48] sm:$0xff] }
  0x4e   :  { %2127 = vmatprep.subr.mxu1 %v822_v32  ;;  %564 = vmatprep.subr.mxu0 %v128_v3  ;;  %v1005_v21 = vld [vmem:[#allocation5 + $0x50] sm:$0xff]  ;;  %v1019_v24 = vld [vmem:[#allocation5 + $0xc0] sm:$0xff]  ;;  %v1018_v26 = vld [vmem:[#allocation5 + $0xb8] sm:$0xff] }
  0x4f   :  { %2078 = vmatmul.mubr.msk.f32.gmra.mxu1 %vm167_vm0, %v2860_v25  ;;  %565 = vmatpush1.msra.mxu0 %v127_v5  ;;  %v1002_v27 = vld [vmem:[#allocation5 + $0x38] sm:$0xff]  ;;  %v1001_v29 = vld [vmem:[#allocation5 + $0x30] sm:$0xff]  ;;  %v1016_v30 = vld [vmem:[#allocation5 + $0xa8] sm:$0xff] }
  0x50   :  { %2063 = vmatmul.mubr.msk.f32.gmra.mxu0 %vm167_vm0, %v2871_v28  ;;  %471 = vmatprep.mubr.f32.mxu1 %v2691_v4  ;;  %v1015_v32 = vld [vmem:[#allocation5 + $0xa0] sm:$0xff] }
  0x51   :  { %316 = vmatprep.mubr.f32.mxu0 %v2691_v4  ;;  %2128 = vmatpush3.msra.mxu1 %v806_v33  ;;  %v999_v33 = vld [vmem:[#allocation5 + $0x20] sm:$0xff] }
  0x52   :  { %2129 = vmatprep.subr.mxu1 %v821_v35  ;;  %566 = vmatprep.subr.mxu0 %v122_v6  ;;  %v998_v35 = vld [vmem:[#allocation5 + $0x18] sm:$0xff] }
  0x53   :  { %2079 = vmatmul.mubr.msk.f32.gmra.mxu1 %vm167_vm0, %v2871_v28  ;;  %567 = vmatpush1.msra.mxu0 %v121_v7 }
  0x54   :  { %2064 = vmatmul.mubr.msk.f32.gmra.mxu0 %vm167_vm0, %v2882_v31  ;;  %477 = vmatprep.mubr.f32.mxu1 %v2691_v4 }
  0x55   :  { %322 = vmatprep.mubr.f32.mxu0 %v2691_v4  ;;  %2130 = vmatpush3.msra.mxu1 %v805_v36  ;;  %v1013_v36 = vld [vmem:[#allocation5 + $0x90] sm:$0xff] }
  0x56   :  { %2131 = vmatprep.subr.mxu1 %v820_v38  ;;  %568 = vmatprep.subr.mxu0 %v116_v8  ;;  %v1012_v38 = vld [vmem:[#allocation5 + $0x88] sm:$0xff] }
  0x57   :  { %2080 = vmatmul.mubr.msk.f32.gmra.mxu1 %vm167_vm0, %v2882_v31  ;;  %569 = vmatpush1.msra.mxu0 %v115_v10 }
  0x58   :  { %2065 = vmatmul.mubr.msk.f32.gmra.mxu0 %vm167_vm0, %v2893_v34  ;;  %483 = vmatprep.mubr.f32.mxu1 %v2691_v4 }
  0x59   :  { %328 = vmatprep.mubr.f32.mxu0 %v2691_v4  ;;  %2132 = vmatpush3.msra.mxu1 %v804_v39  ;;  %v996_v39 = vld [vmem:[#allocation5 + $0x8] sm:$0xff] }
  0x5a   :  { %2133 = vmatprep.subr.mxu1 %v819_v41  ;;  %v995_v41 = vld [vmem:[#allocation5] sm:$0xff] }
  0x5b   :  { %2081 = vmatmul.mubr.msk.f32.gmra.mxu1 %vm167_vm0, %v2893_v34 }
  0x5c   :  { %2066 = vmatmul.mubr.msk.f32.gmra.mxu0 %vm167_vm0, %v2904_v37  ;;  %489 = vmatprep.mubr.f32.mxu1 %v2691_v4 }
  0x5d   :  { %334 = vmatprep.mubr.f32.mxu0 %v2691_v4  ;;  %2134 = vmatpush3.msra.mxu1 %v803_v42  ;;  %v137_v42 = vlaneseq }
  0x5e   :  { %2135 = vmatprep.subr.mxu1 %v818_v44 }
  0x5f   :  { %2082 = vmatmul.mubr.msk.f32.gmra.mxu1 %vm167_vm0, %v2904_v37 }
  0x60   :  { %2067 = vmatmul.mubr.msk.f32.gmra.mxu0 %vm167_vm0, %v2915_v40  ;;  %495 = vmatprep.mubr.f32.mxu1 %v2691_v4 }
  0x61   :  { %340 = vmatprep.mubr.f32.mxu0 %v2691_v4  ;;  %2136 = vmatpush3.msra.mxu1 %v802_v45  ;;  %v3074_v45 = vld [vmem:[%s3583_s2] sm:$0x3f] }
  0x62   :  { %2137 = vmatprep.subr.mxu1 %v817_v47 }
  0x63   :  { %2083 = vmatmul.mubr.msk.f32.gmra.mxu1 %vm167_vm0, %v2915_v40 }
  0x64   :  { %2068 = vmatmul.mubr.msk.f32.gmra.mxu0 %vm167_vm0, %v2926_v43  ;;  %501 = vmatprep.mubr.f32.mxu1 %v2691_v4 }
  0x65   :  { %346 = vmatprep.mubr.f32.mxu0 %v2691_v4  ;;  %2138 = vmatpush3.msra.mxu1 %v801_v48 }
  0x66   :  { %2139 = vmatprep.subr.mxu1 %v816_v50 }
  0x67   :  { %2084 = vmatmul.mubr.msk.f32.gmra.mxu1 %vm167_vm0, %v2926_v43 }
  0x68   :  { %2069 = vmatmul.mubr.msk.f32.gmra.mxu0 %vm167_vm0, %v2937_v46  ;;  %507 = vmatprep.mubr.f32.mxu1 %v2691_v4 }
  0x69   :  { %352 = vmatprep.mubr.f32.mxu0 %v2691_v4  ;;  %2140 = vmatpush3.msra.mxu1 %v800_v51 }
  0x6a   :  { %2141 = vmatprep.subr.mxu1 %v815_v53 }
  0x6b   :  { %2085 = vmatmul.mubr.msk.f32.gmra.mxu1 %vm167_vm0, %v2937_v46 }
  0x6c   :  { %2070 = vmatmul.mubr.msk.f32.gmra.mxu0 %vm167_vm0, %v2948_v49  ;;  %513 = vmatprep.mubr.f32.mxu1 %v2691_v4 }
  0x6d   :  { %358 = vmatprep.mubr.f32.mxu0 %v2691_v4  ;;  %2142 = vmatpush3.msra.mxu1 %v799_v54 }
  0x6e   :  { %2143 = vmatprep.subr.mxu1 %v814_v57 }
  0x6f   :  { %2086 = vmatmul.mubr.msk.f32.gmra.mxu1 %vm167_vm0, %v2948_v49 }
  0x70   :  { %2071 = vmatmul.mubr.msk.f32.gmra.mxu0 %vm167_vm0, %v2959_v52  ;;  %519 = vmatprep.mubr.f32.mxu1 %v2691_v4 }
  0x71   :  { %364 = vmatprep.mubr.f32.mxu0 %v2691_v4  ;;  %2144 = vmatpush3.msra.mxu1 %v798_v58 }
  0x72   :  { %2145 = vmatprep.subr.mxu1 %v813_v59 }
  0x73   :  { %2087 = vmatmul.mubr.msk.f32.gmra.mxu1 %vm167_vm0, %v2959_v52 }
  0x74   :  { %2072 = vmatmul.mubr.msk.f32.gmra.mxu0 %vm167_vm0, %v2970_v55  ;;  %525 = vmatprep.mubr.f32.mxu1 %v2691_v4 }
  0x75   :  { %370 = vmatprep.mubr.f32.mxu0 %v2691_v4  ;;  %2146 = vmatpush3.msra.mxu1 %v797_v60 }
  0x76   :  { %2147 = vmatprep.subr.mxu1 %v812_v61 }
  0x77   :  { %2088 = vmatmul.mubr.msk.f32.gmra.mxu1 %vm167_vm0, %v2970_v55 }
  0x78   :  { %2073 = vmatmul.mubr.msk.f32.gmra.mxu0 %vm167_vm0, %v2981_v56  ;;  %531 = vmatprep.mubr.f32.mxu1 %v2691_v4 }
  0x79   :  { %602 = vmatprep.mubr.f32.mxu0 %v2691_v4  ;;  %2148 = vmatpush3.msra.mxu1 %v796_v62 }
  0x7a   :  { %2149 = vmatprep.subr.mxu1 %v811_v63 }
  0x7b   :  { %2089 = vmatmul.mubr.msk.f32.gmra.mxu1 %vm167_vm0, %v2981_v56 }
  0x7c   :  { %2150 = vmatpush3.msra.mxu1 %v795_v0  ;;  %2090 = vmatmul.mubr.msk.f32.vlgmr.msra.gmra.mxu0 %vm167_vm0, %v2799_v9  ;;  %v1026_v9 = vld [vmem:[#allocation5 + $0xf8] sm:$0xff] }
  0x7d   :  { %608 = vmatprep.mubr.f32.mxu0 %v2691_v4  ;;  %2199 = vmatprep.subr.mxu0 %v1026_v9 }
  0x7e   :  { %2200 = vmatpush3.msra.mxu0 %v1010_v11 }
  0x7f   :  { %2201 = vmatprep.subr.mxu0 %v1025_v12 }
  0x80   :  { %2091 = vmatmul.mubr.msk.f32.gmra.mxu0 %vm167_vm0, %v2819_v14  ;;  %v1024_v14 = vld [vmem:[#allocation5 + $0xe8] sm:$0xff] }
  0x81   :  { %614 = vmatprep.mubr.f32.mxu0 %v2691_v4  ;;  %2202 = vmatpush3.msra.mxu0 %v1009_v13 }
  0x82   :  { %2203 = vmatprep.subr.mxu0 %v1024_v14 }
  0x83   :  { %2204 = vmatpush3.msra.mxu0 %v1008_v15 }
  0x84   :  { %2092 = vmatmul.mubr.msk.f32.gmra.mxu0 %vm167_vm0, %v2839_v19  ;;  %2205 = vmatprep.subr.mxu0 %v1023_v16  ;;  %v1006_v19 = vld [vmem:[#allocation5 + $0x58] sm:$0xff] }
  0x85   :  { %620 = vmatprep.mubr.f32.mxu0 %v2691_v4  ;;  %2206 = vmatpush3.msra.mxu0 %v1007_v17 }
  0x86   :  { %2207 = vmatprep.subr.mxu0 %v1022_v18 }
  0x87   :  { %2208 = vmatpush3.msra.mxu0 %v1006_v19 }
  0x88   :  { %2093 = vmatmul.mubr.msk.f32.gmra.mxu0 %vm167_vm0, %v2849_v22  ;;  %v1020_v22 = vld [vmem:[#allocation5 + $0xc8] sm:$0xff]  ;;  %2209 = vmatprep.subr.mxu0 %v1021_v20 }
  0x89   :  { %626 = vmatprep.mubr.f32.mxu0 %v2691_v4  ;;  %2210 = vmatpush3.msra.mxu0 %v1005_v21 }
  0x8a   :  { %2211 = vmatprep.subr.mxu0 %v1020_v22 }
  0x8b   :  { %2212 = vmatpush3.msra.mxu0 %v1004_v23 }
  0x8c   :  { %2094 = vmatmul.mubr.msk.f32.gmra.mxu0 %vm167_vm0, %v2860_v25  ;;  %v1003_v25 = vld [vmem:[#allocation5 + $0x40] sm:$0xff]  ;;  %2213 = vmatprep.subr.mxu0 %v1019_v24 }
  0x8d   :  { %632 = vmatprep.mubr.f32.mxu0 %v2691_v4  ;;  %2214 = vmatpush3.msra.mxu0 %v1003_v25 }
  0x8e   :  { %2215 = vmatprep.subr.mxu0 %v1018_v26 }
  0x8f   :  { %2216 = vmatpush3.msra.mxu0 %v1002_v27 }
  0x90   :  { %2095 = vmatmul.mubr.msk.f32.gmra.mxu0 %vm167_vm0, %v2871_v28  ;;  %v1017_v28 = vld [vmem:[#allocation5 + $0xb0] sm:$0xff] }
  0x91   :  { %638 = vmatprep.mubr.f32.mxu0 %v2691_v4  ;;  %2217 = vmatprep.subr.mxu0 %v1017_v28 }
  0x92   :  { %2218 = vmatpush3.msra.mxu0 %v1001_v29 }
  0x93   :  { %2219 = vmatprep.subr.mxu0 %v1016_v30 }
  0x94   :  { %2096 = vmatmul.mubr.msk.f32.gmra.mxu0 %vm167_vm0, %v2882_v31  ;;  %v1000_v31 = vld [vmem:[#allocation5 + $0x28] sm:$0xff] }
  0x95   :  { %644 = vmatprep.mubr.f32.mxu0 %v2691_v4  ;;  %2220 = vmatpush3.msra.mxu0 %v1000_v31 }
  0x96   :  { %2221 = vmatprep.subr.mxu0 %v1015_v32 }
  0x97   :  { %2222 = vmatpush3.msra.mxu0 %v999_v33 }
  0x98   :  { %2097 = vmatmul.mubr.msk.f32.gmra.mxu0 %vm167_vm0, %v2893_v34  ;;  %v1014_v34 = vld [vmem:[#allocation5 + $0x98] sm:$0xff] }
  0x99   :  { %650 = vmatprep.mubr.f32.mxu0 %v2691_v4  ;;  %2223 = vmatprep.subr.mxu0 %v1014_v34 }
  0x9a   :  { %2224 = vmatpush3.msra.mxu0 %v998_v35 }
  0x9b   :  { %2225 = vmatprep.subr.mxu0 %v1013_v36 }
  0x9c   :  { %2098 = vmatmul.mubr.msk.f32.gmra.mxu0 %vm167_vm0, %v2904_v37  ;;  %v997_v37 = vld [vmem:[#allocation5 + $0x10] sm:$0xff] }
  0x9d   :  { %656 = vmatprep.mubr.f32.mxu0 %v2691_v4  ;;  %2226 = vmatpush3.msra.mxu0 %v997_v37 }
  0x9e   :  { %2227 = vmatprep.subr.mxu0 %v1012_v38 }
  0x9f   :  { %2228 = vmatpush3.msra.mxu0 %v996_v39 }
  0xa0   :  { %2099 = vmatmul.mubr.msk.f32.gmra.mxu0 %vm167_vm0, %v2915_v40  ;;  %v1011_v40 = vld [vmem:[#allocation5 + $0x80] sm:$0xff] }
  0xa1   :  { %662 = vmatprep.mubr.f32.mxu0 %v2691_v4  ;;  %2229 = vmatprep.subr.mxu0 %v1011_v40 }
  0xa2   :  { %2230 = vmatpush3.msra.mxu0 %v995_v41 }
  0xa3   :  { %2431 = vmatprep.subr.mxu0 %v2691_v4 }
  0xa4   :  { %2100 = vmatmul.mubr.msk.f32.gmra.mxu0 %vm167_vm0, %v2926_v43  ;;  %v3068_v43 = vshrl.u32 %v137_v42, 7 }
  0xa5   :  { %668 = vmatprep.mubr.f32.mxu0 %v2691_v4 }
  0xa6   :  { %v139_v44 = vsub.s32 0, %v3068_v43  ;;  %v147_v50 = vsub.s32 2, %v3068_v43  ;;  %v151_v54 = vsub.s32 3, %v3068_v43 }
  0xa8   :  { %2101 = vmatmul.mubr.msk.f32.gmra.mxu0 %vm167_vm0, %v2937_v46  ;;  %v143_v46 = vsub.s32 1, %v3068_v43  ;;  %v3078_v47 = vrot.slane %v3074_v45, %v139_v44  ;;  %v3088_v57 = vrot.slane %v3074_v45, %v147_v50  ;;  %v3093_v62 = vrot.slane %v3074_v45, %v151_v54 }
  0xa9   :  { %674 = vmatprep.mubr.f32.mxu0 %v2691_v4 }
  0xaa   :  { %v3081_v48 = vrot.slane %v3074_v45, %v143_v46 }
  0xac   :  { %2102 = vmatmul.mubr.msk.f32.gmra.mxu0 %vm167_vm0, %v2948_v49 }
  0xad   :  { %680 = vmatprep.mubr.f32.mxu0 %v2691_v4 }
  0xb0   :  { %2103 = vmatmul.mubr.msk.f32.gmra.mxu0 %vm167_vm0, %v2959_v52 }
  0xb1   :  { %686 = vmatprep.mubr.f32.mxu0 %v2691_v4 }
  0xb4   :  { %2104 = vmatmul.mubr.msk.f32.gmra.mxu0 %vm167_vm0, %v2970_v55 }
  0xb5   :  { %692 = vmatprep.mubr.f32.mxu0 %v2691_v4 }
  0xb8   :  { %2105 = vmatmul.mubr.msk.f32.gmra.mxu0 %vm167_vm0, %v2981_v56 }
  0xfc   :  { %v282_v49 = vpop.f32.mrf.mxu0 }
  0xfd   :  { %v283_v51 = vadd.f32 %v282_v49, %v3078_v47 }
  0xfe   :  { %v284_v52 = vpop.f32.mrf.mxu0 }
  0xff   :  { %v285_v53 = vadd.f32 %v284_v52, %v3081_v48  ;;  %v699_v58 = vmax.f32 %v283_v51, 0.0  ;;  %v443_v0 = vpop.f32.mrf.mxu1 }
 0x100   :  { %v288_v55 = vpop.f32.mrf.mxu0  ;;  %v444_v2 = vadd.f32 %v443_v0, %v3088_v57 }
 0x101   :  { %v700_v56 = vmax.f32 %v285_v53, 0.0  ;;  %v289_v59 = vadd.f32 %v288_v55, %v3078_v47  ;;  %v445_v7 = vpop.f32.mrf.mxu1 }
 0x102   :  { %v290_v60 = vpop.f32.mrf.mxu0  ;;  %v446_v10 = vadd.f32 %v445_v7, %v3093_v62  ;;  %v701_v11 = vmax.f32 %v444_v2, 0.0 }
 0x103   :  { %v291_v61 = vadd.f32 %v290_v60, %v3081_v48  ;;  %898 = vmatprep.mubr.f32.mxu1 %v700_v56  ;;  %v705_v3 = vmax.f32 %v289_v59, 0.0  ;;  %v449_v12 = vpop.f32.mrf.mxu1 }
 0x104   :  { %v294_v63 = vpop.f32.mrf.mxu0  ;;  %899 = vmatmul.mubr.f32.vlgmr.msra.gmra.mxu1 %v699_v58  ;;  %v702_v14 = vmax.f32 %v446_v10, 0.0  ;;  %v450_v15 = vadd.f32 %v449_v12, %v3088_v57 }
 0x105   :  { %v706_v1 = vmax.f32 %v291_v61, 0.0  ;;  %v295_v5 = vadd.f32 %v294_v63, %v3078_v47  ;;  %v451_v19 = vpop.f32.mrf.mxu1 }
 0x106   :  { %v296_v6 = vpop.f32.mrf.mxu0  ;;  %v452_v21 = vadd.f32 %v451_v19, %v3093_v62  ;;  %1098 = vmatprep.mubr.f32.mxu0 %v702_v14  ;;  %v707_v23 = vmax.f32 %v450_v15, 0.0 }
 0x107   :  { %v297_v8 = vadd.f32 %v296_v6, %v3081_v48  ;;  %903 = vmatprep.mubr.f32.mxu1 %v706_v1  ;;  %v711_v16 = vmax.f32 %v295_v5, 0.0  ;;  %v455_v24 = vpop.f32.mrf.mxu1  ;;  %1099 = vmatmul.mubr.f32.vlgmr.msra.gmra.mxu0 %v701_v11 }
 0x108   :  { %v300_v9 = vpop.f32.mrf.mxu0  ;;  %904 = vmatmul.mubr.f32.gmra.mxu1 %v705_v3  ;;  %v708_v26 = vmax.f32 %v452_v21, 0.0  ;;  %v456_v27 = vadd.f32 %v455_v24, %v3088_v57 }
 0x109   :  { %v712_v13 = vmax.f32 %v297_v8, 0.0  ;;  %v301_v17 = vadd.f32 %v300_v9, %v3078_v47  ;;  %v457_v31 = vpop.f32.mrf.mxu1 }
 0x10a   :  { %v302_v18 = vpop.f32.mrf.mxu0  ;;  %v458_v33 = vadd.f32 %v457_v31, %v3093_v62  ;;  %1103 = vmatprep.mubr.f32.mxu0 %v708_v26  ;;  %v713_v35 = vmax.f32 %v456_v27, 0.0 }
 0x10b   :  { %v303_v20 = vadd.f32 %v302_v18, %v3081_v48  ;;  %908 = vmatprep.mubr.f32.mxu1 %v712_v13  ;;  %v717_v28 = vmax.f32 %v301_v17, 0.0  ;;  %v461_v36 = vpop.f32.mrf.mxu1  ;;  %1104 = vmatmul.mubr.f32.gmra.mxu0 %v707_v23 }
 0x10c   :  { %v306_v22 = vpop.f32.mrf.mxu0  ;;  %909 = vmatmul.mubr.f32.gmra.mxu1 %v711_v16  ;;  %v714_v38 = vmax.f32 %v458_v33, 0.0  ;;  %v462_v39 = vadd.f32 %v461_v36, %v3088_v57 }
 0x10d   :  { %v718_v25 = vmax.f32 %v303_v20, 0.0  ;;  %v307_v29 = vadd.f32 %v306_v22, %v3078_v47  ;;  %v463_v46 = vpop.f32.mrf.mxu1 }
 0x10e   :  { %v308_v30 = vpop.f32.mrf.mxu0  ;;  %v464_v50 = vadd.f32 %v463_v46, %v3093_v62  ;;  %1108 = vmatprep.mubr.f32.mxu0 %v714_v38  ;;  %v719_v52 = vmax.f32 %v462_v39, 0.0 }
 0x10f   :  { %v309_v32 = vadd.f32 %v308_v30, %v3081_v48  ;;  %913 = vmatprep.mubr.f32.mxu1 %v718_v25  ;;  %v723_v40 = vmax.f32 %v307_v29, 0.0  ;;  %v467_v53 = vpop.f32.mrf.mxu1  ;;  %1109 = vmatmul.mubr.f32.gmra.mxu0 %v713_v35 }
 0x110   :  { %v312_v34 = vpop.f32.mrf.mxu0  ;;  %914 = vmatmul.mubr.f32.gmra.mxu1 %v717_v28  ;;  %v720_v55 = vmax.f32 %v464_v50, 0.0  ;;  %v468_v56 = vadd.f32 %v467_v53, %v3088_v57 }
 0x111   :  { %v724_v37 = vmax.f32 %v309_v32, 0.0  ;;  %v313_v41 = vadd.f32 %v312_v34, %v3078_v47  ;;  %v469_v61 = vpop.f32.mrf.mxu1 }
 0x112   :  { %v314_v44 = vpop.f32.mrf.mxu0  ;;  %v470_v0 = vadd.f32 %v469_v61, %v3093_v62  ;;  %1113 = vmatprep.mubr.f32.mxu0 %v720_v55  ;;  %v725_v2 = vmax.f32 %v468_v56, 0.0 }
 0x113   :  { %v315_v49 = vadd.f32 %v314_v44, %v3081_v48  ;;  %918 = vmatprep.mubr.f32.mxu1 %v724_v37  ;;  %v729_v58 = vmax.f32 %v313_v41, 0.0  ;;  %v473_v3 = vpop.f32.mrf.mxu1  ;;  %1114 = vmatmul.mubr.f32.gmra.mxu0 %v719_v52 }
 0x114   :  { %v318_v51 = vpop.f32.mrf.mxu0  ;;  %919 = vmatmul.mubr.f32.gmra.mxu1 %v723_v40  ;;  %v726_v6 = vmax.f32 %v470_v0, 0.0  ;;  %v474_v7 = vadd.f32 %v473_v3, %v3088_v57 }
 0x115   :  { %v730_v54 = vmax.f32 %v315_v49, 0.0  ;;  %v319_v59 = vadd.f32 %v318_v51, %v3078_v47  ;;  %v475_v11 = vpop.f32.mrf.mxu1 }
 0x116   :  { %v320_v60 = vpop.f32.mrf.mxu0  ;;  %v476_v13 = vadd.f32 %v475_v11, %v3093_v62  ;;  %1118 = vmatprep.mubr.f32.mxu0 %v726_v6  ;;  %v731_v15 = vmax.f32 %v474_v7, 0.0 }
 0x117   :  { %v321_v63 = vadd.f32 %v320_v60, %v3081_v48  ;;  %923 = vmatprep.mubr.f32.mxu1 %v730_v54  ;;  %v735_v8 = vmax.f32 %v319_v59, 0.0  ;;  %v479_v16 = vpop.f32.mrf.mxu1  ;;  %1119 = vmatmul.mubr.f32.gmra.mxu0 %v725_v2 }
 0x118   :  { %v324_v1 = vpop.f32.mrf.mxu0  ;;  %924 = vmatmul.mubr.f32.gmra.mxu1 %v729_v58  ;;  %v732_v18 = vmax.f32 %v476_v13, 0.0  ;;  %v480_v19 = vadd.f32 %v479_v16, %v3088_v57 }
 0x119   :  { %v736_v5 = vmax.f32 %v321_v63, 0.0  ;;  %v325_v10 = vadd.f32 %v324_v1, %v3078_v47  ;;  %v481_v23 = vpop.f32.mrf.mxu1 }
 0x11a   :  { %v326_v9 = vpop.f32.mrf.mxu0  ;;  %v482_v25 = vadd.f32 %v481_v23, %v3093_v62  ;;  %1123 = vmatprep.mubr.f32.mxu0 %v732_v18  ;;  %v737_v27 = vmax.f32 %v480_v19, 0.0 }
 0x11b   :  { %v327_v12 = vadd.f32 %v326_v9, %v3081_v48  ;;  %928 = vmatprep.mubr.f32.mxu1 %v736_v5  ;;  %v741_v20 = vmax.f32 %v325_v10, 0.0  ;;  %v485_v28 = vpop.f32.mrf.mxu1  ;;  %1124 = vmatmul.mubr.f32.gmra.mxu0 %v731_v15 }
 0x11c   :  { %v330_v14 = vpop.f32.mrf.mxu0  ;;  %929 = vmatmul.mubr.f32.gmra.mxu1 %v735_v8  ;;  %v738_v30 = vmax.f32 %v482_v25, 0.0  ;;  %v486_v31 = vadd.f32 %v485_v28, %v3088_v57 }
 0x11d   :  { %v742_v17 = vmax.f32 %v327_v12, 0.0  ;;  %v331_v21 = vadd.f32 %v330_v14, %v3078_v47  ;;  %v487_v35 = vpop.f32.mrf.mxu1 }
 0x11e   :  { %v332_v22 = vpop.f32.mrf.mxu0  ;;  %v488_v37 = vadd.f32 %v487_v35, %v3093_v62  ;;  %1128 = vmatprep.mubr.f32.mxu0 %v738_v30  ;;  %v743_v39 = vmax.f32 %v486_v31, 0.0 }
 0x11f   :  { %v333_v24 = vadd.f32 %v332_v22, %v3081_v48  ;;  %933 = vmatprep.mubr.f32.mxu1 %v742_v17  ;;  %v747_v32 = vmax.f32 %v331_v21, 0.0  ;;  %v491_v40 = vpop.f32.mrf.mxu1  ;;  %1129 = vmatmul.mubr.f32.gmra.mxu0 %v737_v27 }
 0x120   :  { %v336_v26 = vpop.f32.mrf.mxu0  ;;  %934 = vmatmul.mubr.f32.gmra.mxu1 %v741_v20  ;;  %v744_v44 = vmax.f32 %v488_v37, 0.0  ;;  %v492_v46 = vadd.f32 %v491_v40, %v3088_v57 }
 0x121   :  { %v748_v29 = vmax.f32 %v333_v24, 0.0  ;;  %v337_v33 = vadd.f32 %v336_v26, %v3078_v47  ;;  %v493_v52 = vpop.f32.mrf.mxu1 }
 0x122   :  { %v338_v34 = vpop.f32.mrf.mxu0  ;;  %v494_v54 = vadd.f32 %v493_v52, %v3093_v62  ;;  %1133 = vmatprep.mubr.f32.mxu0 %v744_v44  ;;  %v749_v56 = vmax.f32 %v492_v46, 0.0 }
 0x123   :  { %v339_v36 = vadd.f32 %v338_v34, %v3081_v48  ;;  %938 = vmatprep.mubr.f32.mxu1 %v748_v29  ;;  %v753_v49 = vmax.f32 %v337_v33, 0.0  ;;  %v497_v58 = vpop.f32.mrf.mxu1  ;;  %1134 = vmatmul.mubr.f32.gmra.mxu0 %v743_v39 }
 0x124   :  { %v342_v38 = vpop.f32.mrf.mxu0  ;;  %939 = vmatmul.mubr.f32.gmra.mxu1 %v747_v32  ;;  %v750_v60 = vmax.f32 %v494_v54, 0.0  ;;  %v498_v61 = vadd.f32 %v497_v58, %v3088_v57 }
 0x125   :  { %v754_v41 = vmax.f32 %v339_v36, 0.0  ;;  %v343_v50 = vadd.f32 %v342_v38, %v3078_v47  ;;  %v499_v2 = vpop.f32.mrf.mxu1 }
 0x126   :  { %v344_v51 = vpop.f32.mrf.mxu0  ;;  %v500_v5 = vadd.f32 %v499_v2, %v3093_v62  ;;  %1138 = vmatprep.mubr.f32.mxu0 %v750_v60  ;;  %v755_v7 = vmax.f32 %v498_v61, 0.0 }
 0x127   :  { %v345_v53 = vadd.f32 %v344_v51, %v3081_v48  ;;  %943 = vmatprep.mubr.f32.mxu1 %v754_v41  ;;  %v759_v63 = vmax.f32 %v343_v50, 0.0  ;;  %v503_v8 = vpop.f32.mrf.mxu1  ;;  %1139 = vmatmul.mubr.f32.gmra.mxu0 %v749_v56 }
 0x128   :  { %v348_v55 = vpop.f32.mrf.mxu0  ;;  %944 = vmatmul.mubr.f32.gmra.mxu1 %v753_v49  ;;  %v756_v9 = vmax.f32 %v500_v5, 0.0  ;;  %v504_v11 = vadd.f32 %v503_v8, %v3088_v57 }
 0x129   :  { %v760_v59 = vmax.f32 %v345_v53, 0.0  ;;  %v349_v0 = vadd.f32 %v348_v55, %v3078_v47  ;;  %v505_v15 = vpop.f32.mrf.mxu1 }
 0x12a   :  { %v350_v1 = vpop.f32.mrf.mxu0  ;;  %v506_v17 = vadd.f32 %v505_v15, %v3093_v62  ;;  %1143 = vmatprep.mubr.f32.mxu0 %v756_v9  ;;  %v761_v19 = vmax.f32 %v504_v11, 0.0  ;;  %v1194_v11 = vld [vmem:[#allocation7 + $0x78] sm:$0xff]  ;;  %v1193_v15 = vld [vmem:[#allocation7 + $0x70] sm:$0xff] }
 0x12b   :  { %v351_v3 = vadd.f32 %v350_v1, %v3081_v48  ;;  %948 = vmatprep.mubr.f32.mxu1 %v760_v59  ;;  %v765_v12 = vmax.f32 %v349_v0, 0.0  ;;  %v509_v20 = vpop.f32.mrf.mxu1  ;;  %1144 = vmatmul.mubr.f32.gmra.mxu0 %v755_v7 }
 0x12c   :  { %v354_v6 = vpop.f32.mrf.mxu0  ;;  %949 = vmatmul.mubr.f32.gmra.mxu1 %v759_v63  ;;  %v762_v22 = vmax.f32 %v506_v17, 0.0  ;;  %v510_v23 = vadd.f32 %v509_v20, %v3088_v57  ;;  %v1192_v17 = vld [vmem:[#allocation7 + $0x68] sm:$0xff]  ;;  %v1205_v20 = vld [vmem:[#allocation7 + $0xd0] sm:$0xff] }
 0x12d   :  { %v766_v10 = vmax.f32 %v351_v3, 0.0  ;;  %v355_v13 = vadd.f32 %v354_v6, %v3078_v47  ;;  %v511_v27 = vpop.f32.mrf.mxu1 }
 0x12e   :  { %v356_v14 = vpop.f32.mrf.mxu0  ;;  %v512_v29 = vadd.f32 %v511_v27, %v3093_v62  ;;  %1148 = vmatprep.mubr.f32.mxu0 %v762_v22  ;;  %v767_v31 = vmax.f32 %v510_v23, 0.0  ;;  %v1204_v22 = vld [vmem:[#allocation7 + $0xc8] sm:$0xff]  ;;  %v1186_v27 = vld [vmem:[#allocation7 + $0x38] sm:$0xff] }
 0x12f   :  { %v357_v16 = vadd.f32 %v356_v14, %v3081_v48  ;;  %953 = vmatprep.mubr.f32.mxu1 %v766_v10  ;;  %v771_v24 = vmax.f32 %v355_v13, 0.0  ;;  %v515_v32 = vpop.f32.mrf.mxu1  ;;  %1149 = vmatmul.mubr.f32.gmra.mxu0 %v761_v19  ;;  %v1210_v10 = vld [vmem:[#allocation7 + $0xf8] sm:$0xff]  ;;  %v1209_v13 = vld [vmem:[#allocation7 + $0xf0] sm:$0xff]  ;;  %v1188_v23 = vld [vmem:[#allocation7 + $0x48] sm:$0xff] }
 0x130   :  { %v360_v18 = vpop.f32.mrf.mxu0  ;;  %954 = vmatmul.mubr.f32.gmra.mxu1 %v765_v12  ;;  %v768_v34 = vmax.f32 %v512_v29, 0.0  ;;  %v516_v35 = vadd.f32 %v515_v32, %v3088_v57  ;;  %2279 = vmatprep.subr.mxu1 %v1210_v10  ;;  %v1190_v19 = vld [vmem:[#allocation7 + $0x58] sm:$0xff]  ;;  %v1185_v29 = vld [vmem:[#allocation7 + $0x30] sm:$0xff]  ;;  %v1199_v32 = vld [vmem:[#allocation7 + $0xa0] sm:$0xff] }
 0x131   :  { %v772_v21 = vmax.f32 %v357_v16, 0.0  ;;  %v361_v25 = vadd.f32 %v360_v18, %v3078_v47  ;;  %v517_v39 = vpop.f32.mrf.mxu1  ;;  %2280 = vmatpush3.msra.mxu1 %v1194_v11  ;;  %v1208_v16 = vld [vmem:[#allocation7 + $0xe8] sm:$0xff]  ;;  %v1206_v18 = vld [vmem:[#allocation7 + $0xd8] sm:$0xff] }
 0x132   :  { %v362_v26 = vpop.f32.mrf.mxu0  ;;  %v518_v41 = vadd.f32 %v517_v39, %v3093_v62  ;;  %1153 = vmatprep.mubr.f32.mxu0 %v768_v34  ;;  %v773_v46 = vmax.f32 %v516_v35, 0.0  ;;  %2281 = vmatprep.subr.mxu1 %v1209_v13  ;;  %v159_v34 = vsub.s32 5, %v3068_v43  ;;  %v1198_v35 = vld [vmem:[#allocation7 + $0x98] sm:$0xff] }
 0x133   :  { %v363_v28 = vadd.f32 %v362_v26, %v3081_v48  ;;  %958 = vmatprep.mubr.f32.mxu1 %v772_v21  ;;  %v777_v36 = vmax.f32 %v361_v25, 0.0  ;;  %v521_v49 = vpop.f32.mrf.mxu1  ;;  %1154 = vmatmul.mubr.f32.gmra.mxu0 %v767_v31  ;;  %v1189_v21 = vld [vmem:[#allocation7 + $0x50] sm:$0xff]  ;;  %v1187_v25 = vld [vmem:[#allocation7 + $0x40] sm:$0xff]  ;;  %v1202_v26 = vld [vmem:[#allocation7 + $0xb8] sm:$0xff] }
 0x134   :  { %v366_v30 = vpop.f32.mrf.mxu0  ;;  %959 = vmatmul.mubr.f32.gmra.mxu1 %v771_v24  ;;  %v774_v51 = vmax.f32 %v518_v41, 0.0  ;;  %v522_v52 = vadd.f32 %v521_v49, %v3088_v57  ;;  %v1203_v24 = vld [vmem:[#allocation7 + $0xc0] sm:$0xff]  ;;  %v1184_v31 = vld [vmem:[#allocation7 + $0x28] sm:$0xff]  ;;  %v3158_v39 = vrot.slane %v3074_v45, %v159_v34 }
 0x135   :  { %v778_v33 = vmax.f32 %v363_v28, 0.0  ;;  %v367_v37 = vadd.f32 %v366_v30, %v3078_v47  ;;  %v523_v56 = vpop.f32.mrf.mxu1  ;;  %2282 = vmatpush3.msra.mxu1 %v1193_v15  ;;  %v1201_v28 = vld [vmem:[#allocation7 + $0xb0] sm:$0xff]  ;;  %v1200_v30 = vld [vmem:[#allocation7 + $0xa8] sm:$0xff] }
 0x136   :  { %v368_v38 = vpop.f32.mrf.mxu0  ;;  %v524_v59 = vadd.f32 %v523_v56, %v3093_v62  ;;  %1158 = vmatprep.mubr.f32.mxu0 %v774_v51  ;;  %v779_v60 = vmax.f32 %v522_v52, 0.0  ;;  %2283 = vmatprep.subr.mxu1 %v1208_v16  ;;  %v1180_v52 = vld [vmem:[#allocation7 + $0x8] sm:$0xff] }
 0x137   :  { %v369_v40 = vadd.f32 %v368_v38, %v3081_v48  ;;  %963 = vmatprep.mubr.f32.mxu1 %v778_v33  ;;  %v783_v53 = vmax.f32 %v367_v37, 0.0  ;;  %v527_v61 = vpop.f32.mrf.mxu1  ;;  %1159 = vmatmul.mubr.f32.gmra.mxu0 %v773_v46  ;;  %v1183_v33 = vld [vmem:[#allocation7 + $0x20] sm:$0xff]  ;;  %v1182_v38 = vld [vmem:[#allocation7 + $0x18] sm:$0xff]  ;;  %v1181_v46 = vld [vmem:[#allocation7 + $0x10] sm:$0xff] }
 0x138   :  { %v372_v44 = vpop.f32.mrf.mxu0  ;;  %964 = vmatmul.mubr.f32.gmra.mxu1 %v777_v36  ;;  %v780_v0 = vmax.f32 %v524_v59, 0.0  ;;  %v528_v1 = vadd.f32 %v527_v61, %v3088_v57  ;;  %v155_v36 = vsub.s32 4, %v3068_v43 }
 0x139   :  { %v784_v50 = vmax.f32 %v369_v40, 0.0  ;;  %v373_v54 = vadd.f32 %v372_v44, %v3078_v47  ;;  %v529_v3 = vpop.f32.mrf.mxu1  ;;  %2284 = vmatpush3.msra.mxu1 %v1192_v17  ;;  %v1197_v40 = vld [vmem:[#allocation7 + $0x90] sm:$0xff] }
 0x13a   :  { %v374_v55 = vpop.f32.mrf.mxu0  ;;  %v530_v47 = vadd.f32 %v529_v3, %v3093_v62  ;;  %1163 = vmatprep.mubr.f32.mxu0 %v780_v0  ;;  %v3161_v41 = vrot.slane %v3074_v45, %v155_v36  ;;  %v1179_v45 = vld [vmem:[#allocation7] sm:$0xff] }
 0x13b   :  { %v375_v58 = vadd.f32 %v374_v55, %v3081_v48  ;;  %968 = vmatprep.mubr.f32.mxu1 %v784_v50  ;;  %v789_v2 = vmax.f32 %v373_v54, 0.0  ;;  %v785_v48 = vmax.f32 %v528_v1, 0.0  ;;  %v533_v5 = vpop.f32.mrf.mxu1  ;;  %1164 = vmatmul.mubr.f32.gmra.mxu0 %v779_v60  ;;  %v1196_v50 = vld [vmem:[#allocation7 + $0x88] sm:$0xff]  ;;  %v1195_v54 = vld [vmem:[#allocation7 + $0x80] sm:$0xff] }
 0x13c   :  { %969 = vmatmul.mubr.f32.gmra.mxu1 %v783_v53  ;;  %v786_v6 = vmax.f32 %v530_v47, 0.0  ;;  %v534_v7 = vadd.f32 %v533_v5, %v3088_v57  ;;  %v1207_v57 = vld [vmem:[#allocation7 + $0xe0] sm:$0xff]  ;;  %v604_v37 = vpop.f32.mrf.mxu0 }
 0x13d   :  { %v790_v63 = vmax.f32 %v375_v58, 0.0  ;;  %v535_v8 = vpop.f32.mrf.mxu1  ;;  %2285 = vmatprep.subr.mxu1 %v1207_v57  ;;  %v605_v43 = vadd.f32 %v604_v37, %v3161_v41 }
 0x13e   :  { %v536_v9 = vadd.f32 %v535_v8, %v3093_v62  ;;  %1168 = vmatprep.mubr.f32.mxu0 %v786_v6  ;;  %v791_v12 = vmax.f32 %v534_v7, 0.0  ;;  %v1191_v62 = vld [vmem:[#allocation7 + $0x60] sm:$0xff]  ;;  %v606_v44 = vpop.f32.mrf.mxu0 }
 0x13f   :  { %973 = vmatprep.mubr.f32.mxu1 %v790_v63  ;;  %1169 = vmatmul.mubr.f32.gmra.mxu0 %v785_v48  ;;  %v607_v49 = vadd.f32 %v606_v44, %v3158_v39  ;;  %v703_v55 = vmax.f32 %v605_v43, 0.0 }
 0x140   :  { %974 = vmatmul.mubr.f32.gmra.mxu1 %v789_v2  ;;  %v792_v14 = vmax.f32 %v536_v9, 0.0  ;;  %v610_v51 = vpop.f32.mrf.mxu0 }
 0x141   :  { %2286 = vmatpush3.msra.mxu1 %v1191_v62  ;;  %v704_v53 = vmax.f32 %v607_v49, 0.0  ;;  %v611_v59 = vadd.f32 %v610_v51, %v3161_v41 }
 0x142   :  { %1173 = vmatprep.mubr.f32.mxu0 %v792_v14  ;;  %2287 = vmatprep.subr.mxu1 %v1206_v18  ;;  %v612_v56 = vpop.f32.mrf.mxu0 }
 0x143   :  { %1174 = vmatmul.mubr.f32.gmra.mxu0 %v791_v12  ;;  %2288 = vmatpush3.msra.mxu1 %v1190_v19  ;;  %v613_v58 = vadd.f32 %v612_v56, %v3158_v39  ;;  %v709_v63 = vmax.f32 %v611_v59, 0.0 }
 0x144   :  { %2289 = vmatprep.subr.mxu1 %v1205_v20  ;;  %1282 = vmatprep.mubr.f32.mxu1 %v704_v53  ;;  %v616_v60 = vpop.f32.mrf.mxu0 }
 0x145   :  { %2290 = vmatpush3.msra.mxu1 %v1189_v21  ;;  %v710_v61 = vmax.f32 %v613_v58, 0.0  ;;  %v617_v2 = vadd.f32 %v616_v60, %v3161_v41  ;;  %2447 = vmatprep.mubr.msk.f32.mxu0 %vm2692_vm1, %v2691_v4 }
 0x146   :  { %2291 = vmatprep.subr.mxu1 %v1204_v22  ;;  %v618_v0 = vpop.f32.mrf.mxu0 }
 0x147   :  { %2292 = vmatpush3.msra.mxu1 %v1188_v23  ;;  %v619_v1 = vadd.f32 %v618_v0, %v3158_v39  ;;  %v715_v48 = vmax.f32 %v617_v2, 0.0 }
 0x148   :  { %2293 = vmatprep.subr.mxu1 %v1203_v24  ;;  %v622_v3 = vpop.f32.mrf.mxu0 }
 0x149   :  { %2294 = vmatpush3.msra.mxu1 %v1187_v25  ;;  %v716_v47 = vmax.f32 %v619_v1, 0.0  ;;  %v623_v7 = vadd.f32 %v622_v3, %v3161_v41 }
 0x14a   :  { %2295 = vmatprep.subr.mxu1 %v1202_v26  ;;  %v624_v5 = vpop.f32.mrf.mxu0 }
 0x14b   :  { %2296 = vmatpush3.msra.mxu1 %v1186_v27  ;;  %v625_v6 = vadd.f32 %v624_v5, %v3158_v39  ;;  %v721_v9 = vmax.f32 %v623_v7, 0.0 }
 0x14c   :  { %2297 = vmatprep.subr.mxu1 %v1201_v28  ;;  %v628_v8 = vpop.f32.mrf.mxu0 }
 0x14d   :  { %2298 = vmatpush3.msra.mxu1 %v1185_v29  ;;  %v722_v10 = vmax.f32 %v625_v6, 0.0  ;;  %v629_v13 = vadd.f32 %v628_v8, %v3161_v41 }
 0x14e   :  { %2299 = vmatprep.subr.mxu1 %v1200_v30  ;;  %v630_v11 = vpop.f32.mrf.mxu0 }
 0x14f   :  { %2300 = vmatpush3.msra.mxu1 %v1184_v31  ;;  %v631_v12 = vadd.f32 %v630_v11, %v3158_v39  ;;  %v727_v16 = vmax.f32 %v629_v13, 0.0 }
 0x150   :  { %2301 = vmatprep.subr.mxu1 %v1199_v32  ;;  %v634_v14 = vpop.f32.mrf.mxu0 }
 0x151   :  { %2302 = vmatpush3.msra.mxu1 %v1183_v33  ;;  %v728_v15 = vmax.f32 %v631_v12, 0.0  ;;  %v635_v62 = vadd.f32 %v634_v14, %v3161_v41 }
 0x152   :  { %2303 = vmatprep.subr.mxu1 %v1198_v35  ;;  %v636_v17 = vpop.f32.mrf.mxu0 }
 0x153   :  { %2304 = vmatpush3.msra.mxu1 %v1182_v38  ;;  %v637_v57 = vadd.f32 %v636_v17, %v3158_v39  ;;  %v733_v20 = vmax.f32 %v635_v62, 0.0 }
 0x154   :  { %2305 = vmatprep.subr.mxu1 %v1197_v40  ;;  %v640_v18 = vpop.f32.mrf.mxu0 }
 0x155   :  { %2306 = vmatpush3.msra.mxu1 %v1181_v46  ;;  %v734_v19 = vmax.f32 %v637_v57, 0.0  ;;  %v641_v23 = vadd.f32 %v640_v18, %v3161_v41 }
 0x156   :  { %2307 = vmatprep.subr.mxu1 %v1196_v50  ;;  %v642_v21 = vpop.f32.mrf.mxu0 }
 0x157   :  { %2308 = vmatpush3.msra.mxu1 %v1180_v52  ;;  %v643_v22 = vadd.f32 %v642_v21, %v3158_v39  ;;  %v739_v26 = vmax.f32 %v641_v23, 0.0 }
 0x158   :  { %2309 = vmatprep.subr.mxu1 %v1195_v54  ;;  %v646_v24 = vpop.f32.mrf.mxu0 }
 0x159   :  { %2310 = vmatpush3.msra.mxu1 %v1179_v45  ;;  %v740_v25 = vmax.f32 %v643_v22, 0.0  ;;  %v647_v29 = vadd.f32 %v646_v24, %v3161_v41 }
 0x15a   :  { %1283 = vmatmul.mubr.f32.vlgmr.msra.gmra.mxu1 %v703_v55  ;;  %2450 = vmatprep.subr.mxu1 %v2691_v4  ;;  %v648_v27 = vpop.f32.mrf.mxu0 }
 0x15b   :  { %1287 = vmatprep.mubr.f32.mxu1 %v710_v61  ;;  %v649_v28 = vadd.f32 %v648_v27, %v3158_v39  ;;  %v745_v32 = vmax.f32 %v647_v29, 0.0 }
 0x15c   :  { %v652_v30 = vpop.f32.mrf.mxu0 }
 0x15d   :  { %v746_v31 = vmax.f32 %v649_v28, 0.0  ;;  %v653_v35 = vadd.f32 %v652_v30, %v3161_v41 }
 0x15e   :  { %1288 = vmatmul.mubr.f32.gmra.mxu1 %v709_v63  ;;  %v654_v33 = vpop.f32.mrf.mxu0 }
 0x15f   :  { %1292 = vmatprep.mubr.f32.mxu1 %v716_v47  ;;  %v655_v34 = vadd.f32 %v654_v33, %v3158_v39  ;;  %v751_v38 = vmax.f32 %v653_v35, 0.0 }
 0x160   :  { %v658_v36 = vpop.f32.mrf.mxu0 }
 0x161   :  { %v752_v37 = vmax.f32 %v655_v34, 0.0  ;;  %v659_v46 = vadd.f32 %v658_v36, %v3161_v41 }
 0x162   :  { %1293 = vmatmul.mubr.f32.gmra.mxu1 %v715_v48  ;;  %v660_v40 = vpop.f32.mrf.mxu0 }
 0x163   :  { %1297 = vmatprep.mubr.f32.mxu1 %v722_v10  ;;  %v661_v44 = vadd.f32 %v660_v40, %v3158_v39  ;;  %v757_v43 = vmax.f32 %v659_v46, 0.0 }
 0x164   :  { %v664_v49 = vpop.f32.mrf.mxu0 }
 0x165   :  { %v758_v50 = vmax.f32 %v661_v44, 0.0  ;;  %v665_v53 = vadd.f32 %v664_v49, %v3161_v41 }
 0x166   :  { %1298 = vmatmul.mubr.f32.gmra.mxu1 %v721_v9  ;;  %v666_v51 = vpop.f32.mrf.mxu0 }
 0x167   :  { %1302 = vmatprep.mubr.f32.mxu1 %v728_v15  ;;  %v667_v52 = vadd.f32 %v666_v51, %v3158_v39  ;;  %v763_v45 = vmax.f32 %v665_v53, 0.0 }
 0x168   :  { %v670_v54 = vpop.f32.mrf.mxu0 }
 0x169   :  { %v764_v55 = vmax.f32 %v667_v52, 0.0  ;;  %v671_v56 = vadd.f32 %v670_v54, %v3161_v41  ;;  %v3235_v54 = vld [vmem:[%s3585_s4] ss:$0 sm:$0xff] }
 0x16a   :  { %1303 = vmatmul.mubr.f32.gmra.mxu1 %v727_v16  ;;  %v672_v58 = vpop.f32.mrf.mxu0 }
 0x16b   :  { %1307 = vmatprep.mubr.f32.mxu1 %v734_v19  ;;  %v673_v59 = vadd.f32 %v672_v58, %v3158_v39  ;;  %v769_v60 = vmax.f32 %v671_v56, 0.0 }
 0x16c   :  { %v676_v61 = vpop.f32.mrf.mxu0 }
 0x16d   :  { %v770_v63 = vmax.f32 %v673_v59, 0.0  ;;  %v677_v0 = vadd.f32 %v676_v61, %v3161_v41 }
 0x16e   :  { %1308 = vmatmul.mubr.f32.gmra.mxu1 %v733_v20  ;;  %v678_v1 = vpop.f32.mrf.mxu0 }
 0x16f   :  { %1312 = vmatprep.mubr.f32.mxu1 %v740_v25  ;;  %v679_v2 = vadd.f32 %v678_v1, %v3158_v39  ;;  %v775_v3 = vmax.f32 %v677_v0, 0.0 }
 0x170   :  { %v682_v47 = vpop.f32.mrf.mxu0 }
 0x171   :  { %v776_v48 = vmax.f32 %v679_v2, 0.0  ;;  %v683_v5 = vadd.f32 %v682_v47, %v3161_v41 }
 0x172   :  { %1313 = vmatmul.mubr.f32.gmra.mxu1 %v739_v26  ;;  %v684_v6 = vpop.f32.mrf.mxu0 }
 0x173   :  { %1317 = vmatprep.mubr.f32.mxu1 %v746_v31  ;;  %v685_v7 = vadd.f32 %v684_v6, %v3158_v39  ;;  %v781_v8 = vmax.f32 %v683_v5, 0.0 }
 0x174   :  { %v688_v10 = vpop.f32.mrf.mxu0 }
 0x175   :  { %v782_v9 = vmax.f32 %v685_v7, 0.0  ;;  %v689_v11 = vadd.f32 %v688_v10, %v3161_v41 }
 0x176   :  { %1318 = vmatmul.mubr.f32.gmra.mxu1 %v745_v32  ;;  %v690_v12 = vpop.f32.mrf.mxu0 }
 0x177   :  { %1322 = vmatprep.mubr.f32.mxu1 %v752_v37  ;;  %v691_v13 = vadd.f32 %v690_v12, %v3158_v39  ;;  %v787_v14 = vmax.f32 %v689_v11, 0.0 }
 0x178   :  { %v694_v15 = vpop.f32.mrf.mxu0 }
 0x179   :  { %v788_v16 = vmax.f32 %v691_v13, 0.0  ;;  %v695_v17 = vadd.f32 %v694_v15, %v3161_v41 }
 0x17a   :  { %1323 = vmatmul.mubr.f32.gmra.mxu1 %v751_v38  ;;  %v696_v57 = vpop.f32.mrf.mxu0 }
 0x17b   :  { %1327 = vmatprep.mubr.f32.mxu1 %v758_v50  ;;  %v697_v62 = vadd.f32 %v696_v57, %v3158_v39  ;;  %v793_v18 = vmax.f32 %v695_v17, 0.0 }
 0x17d   :  { %v794_v19 = vmax.f32 %v697_v62, 0.0 }
 0x17e   :  { %1328 = vmatmul.mubr.f32.gmra.mxu1 %v757_v43 }
 0x17f   :  { %1332 = vmatprep.mubr.f32.mxu1 %v764_v55 }
 0x182   :  { %1333 = vmatmul.mubr.f32.gmra.mxu1 %v763_v45 }
 0x183   :  { %1337 = vmatprep.mubr.f32.mxu1 %v770_v63 }
 0x186   :  { %1338 = vmatmul.mubr.f32.gmra.mxu1 %v769_v60 }
 0x187   :  { %1342 = vmatprep.mubr.f32.mxu1 %v776_v48 }
 0x18a   :  { %1343 = vmatmul.mubr.f32.gmra.mxu1 %v775_v3 }
 0x18b   :  { %1347 = vmatprep.mubr.f32.mxu1 %v782_v9 }
 0x18e   :  { %1348 = vmatmul.mubr.f32.gmra.mxu1 %v781_v8 }
 0x18f   :  { %1352 = vmatprep.mubr.f32.mxu1 %v788_v16 }
 0x192   :  { %1353 = vmatmul.mubr.f32.gmra.mxu1 %v787_v14 }
 0x193   :  { %1357 = vmatprep.mubr.f32.mxu1 %v794_v19 }
 0x196   :  { %1358 = vmatmul.mubr.f32.gmra.mxu1 %v793_v18 }
 0x197   :  { %2466 = vmatprep.mubr.msk.f32.mxu1 %vm2692_vm1, %v2691_v4 }
 0x1c4   :  { %v3200_v20 = vpop.f32.mrf.mxu1 }
 0x1c6   :  { %v3202_v21 = vpop.f32.mrf.mxu1 }
 0x1c7   :  { %v3208_v24 = vpop.f32.mrf.mxu0 }
 0x1c8   :  { %v3204_v22 = vpop.f32.mrf.mxu1 }
 0x1c9   :  { %v3210_v25 = vpop.f32.mrf.mxu0 }
 0x1ca   :  { %v3206_v23 = vpop.f32.mrf.mxu1 }
 0x1cb   :  { %v3212_v27 = vpop.f32.mrf.mxu0 }
 0x1cc   :  { %v2157_v41 = vpop.f32.mrf.mxu1 }
 0x1cd   :  { %v3214_v29 = vpop.f32.mrf.mxu0 }
 0x1ce   :  { %v2158_v39 = vpop.f32.mrf.mxu1 }
 0x1cf   :  { %v3216_v31 = vpop.f32.mrf.mxu0  ;;  %v2159_v17 = vadd.f32 %v2158_v39, %v2157_v41 }
 0x1d0   :  { %v2160_v26 = vpop.f32.mrf.mxu1 }
 0x1d1   :  { %v3218_v33 = vpop.f32.mrf.mxu0 }
 0x1d2   :  { %v2161_v28 = vpop.f32.mrf.mxu1 }
 0x1d3   :  { %v3220_v35 = vpop.f32.mrf.mxu0  ;;  %v2162_v9 = vadd.f32 %v2161_v28, %v2160_v26 }
 0x1d4   :  { %v2163_v30 = vpop.f32.mrf.mxu1 }
 0x1d5   :  { %v3222_v37 = vpop.f32.mrf.mxu0  ;;  %v916_v57 = vadd.f32 %v2162_v9, %v3235_v54 }
 0x1d6   :  { %v2164_v32 = vpop.f32.mrf.mxu1 }
 0x1d7   :  { %v3224_v40 = vpop.f32.mrf.mxu0  ;;  %v2165_v47 = vadd.f32 %v2164_v32, %v2163_v30  ;;  %v2156_v30 = vadd.f32 %v3206_v23, %v3204_v22  ;;  %v911_v32 = vadd.f32 %v2159_v17, %v3235_v54 }
 0x1d8   :  { %v2166_v34 = vpop.f32.mrf.mxu1 }
 0x1d9   :  { %v3226_v46 = vpop.f32.mrf.mxu0  ;;  %v921_v11 = vadd.f32 %v2165_v47, %v3235_v54 }
 0x1da   :  { %v2167_v36 = vpop.f32.mrf.mxu1 }
 0x1db   :  { %v3228_v50 = vpop.f32.mrf.mxu0  ;;  %v2168_v60 = vadd.f32 %v2167_v36, %v2166_v34  ;;  %v983_v62 = vmax.f32 %v921_v11, 0.0  ;;  %v982_v34 = vmax.f32 %v916_v57, 0.0 }
 0x1dc   :  { %v2169_v38 = vpop.f32.mrf.mxu1 }
 0x1dd   :  { %v3230_v51 = vpop.f32.mrf.mxu0  ;;  %v926_v48 = vadd.f32 %v2168_v60, %v3235_v54 }
 0x1de   :  { %v2170_v44 = vpop.f32.mrf.mxu1 }
 0x1df   :  { %v2171_v52 = vadd.f32 %v2170_v44, %v2169_v38  ;;  %v3239_v56 = vpop.f32.mrf.mxu0  ;;  %v984_v12 = vmax.f32 %v926_v48, 0.0  ;;  %v2153_v38 = vadd.f32 %v3202_v21, %v3200_v20  ;;  %v906_v44 = vadd.f32 %v2156_v30, %v3235_v54  ;;  %v3295_v20 = vld [vmem:[%s3588_s7] ss:$0 sm:$0xff] }
 0x1e0   :  { %v2172_v49 = vpop.f32.mrf.mxu1 }
 0x1e1   :  { %v3244_v59 = vpop.f32.mrf.mxu0  ;;  %v931_v61 = vadd.f32 %v2171_v52, %v3235_v54  ;;  %v901_v23 = vadd.f32 %v2153_v38, %v3235_v54 }
 0x1e2   :  { %v2173_v43 = vpop.f32.mrf.mxu1 }
 0x1e3   :  { %v2174_v53 = vadd.f32 %v2173_v43, %v2172_v49  ;;  %v2252_v1 = vpop.f32.mrf.mxu0  ;;  %v985_v5 = vmax.f32 %v931_v61, 0.0  ;;  %v981_v49 = vmax.f32 %v911_v32, 0.0 }
 0x1e4   :  { %v3237_v55 = vpop.f32.mrf.mxu1 }
 0x1e5   :  { %v936_v45 = vadd.f32 %v2174_v53, %v3235_v54  ;;  %v2253_v3 = vpop.f32.mrf.mxu0  ;;  %v980_v53 = vmax.f32 %v906_v44, 0.0 }
 0x1e6   :  { %v3242_v58 = vpop.f32.mrf.mxu1  ;;  %v2254_v60 = vadd.f32 %v2253_v3, %v2252_v1  ;;  %v3305_v1 = vld [vmem:[%s3586_s5] sm:$0x1]  ;;  %v2248_v3 = vadd.f32 %v3230_v51, %v3228_v50  ;;  %v2242_v50 = vadd.f32 %v3222_v37, %v3220_v35  ;;  %v2233_v35 = vadd.f32 %v3210_v25, %v3208_v24  ;;  %s1364_s5 = sld [smem:[#allocation8]] }
 0x1e7   :  { %v986_v63 = vmax.f32 %v936_v45, 0.0  ;;  %v3255_v7 = vpop.f32.mrf.mxu0 }
 0x1e8   :  { %v3247_v0 = vpop.f32.mrf.mxu1  ;;  %v3310_v11 = vadd.f32 %v2254_v60, %v3295_v20  ;;  %v3325_v51 = vadd.f32 %v2248_v3, %v3295_v20  ;;  %v3368_v38 = vadd.f32 %v2233_v35, %v3295_v20 }
 0x1e9   :  { %2432 = vmatpush3.xpose.msra.mxu0 %v986_v63  ;;  %v3260_v10 = vpop.f32.mrf.mxu0  ;;  %v979_v63 = vmax.f32 %v901_v23, 0.0 }
 0x1ea   :  { %v3249_v2 = vpop.f32.mrf.mxu1  ;;  %2433 = vmatprep.subr.mxu0 %v2691_v4 }
 0x1eb   :  { %v3265_v14 = vpop.f32.mrf.mxu0 }
 0x1ec   :  { %v3253_v6 = vpop.f32.mrf.mxu1 }
 0x1ed   :  { %2434 = vmatpush3.xpose.msra.mxu0 %v985_v5  ;;  %v3270_v16 = vpop.f32.mrf.mxu0  ;;  %v2251_v5 = vadd.f32 %v3244_v59, %v3239_v56 }
 0x1ee   :  { %v3257_v8 = vpop.f32.mrf.mxu1  ;;  %2435 = vmatprep.subr.mxu0 %v2691_v4 }
 0x1ef   :  { %v3273_v19 = vpop.f32.mrf.mxu0  ;;  %v2183_v25 = vadd.f32 %v3257_v8, %v3253_v6  ;;  %v2180_v6 = vadd.f32 %v3249_v2, %v3247_v0 }
 0x1f0   :  { %v3263_v13 = vpop.f32.mrf.mxu1 }
 0x1f1   :  { %2436 = vmatpush3.xpose.msra.mxu0 %v984_v12  ;;  %v3276_v28 = vpop.f32.mrf.mxu0  ;;  %v2245_v12 = vadd.f32 %v3226_v46, %v3224_v40  ;;  %v2239_v40 = vadd.f32 %v3218_v33, %v3216_v31  ;;  %v2236_v31 = vadd.f32 %v3214_v29, %v3212_v27  ;;  %v3343_v33 = vadd.f32 %v2242_v50, %v3295_v20 }
 0x1f2   :  { %v3267_v15 = vpop.f32.mrf.mxu1  ;;  %2437 = vmatprep.subr.mxu0 %v2691_v4  ;;  %v951_v8 = vadd.f32 %v2183_v25, %v3235_v54  ;;  %v946_v23 = vadd.f32 %v2180_v6, %v3235_v54 }
 0x1f3   :  { %v3282_v39 = vpop.f32.mrf.mxu0  ;;  %v3354_v27 = vadd.f32 %v2239_v40, %v3295_v20  ;;  %v3359_v29 = vadd.f32 %v2236_v31, %v3295_v20 }
 0x1f4   :  { %v2187_v18 = vpop.f32.mrf.mxu1 }
 0x1f5   :  { %2438 = vmatpush3.xpose.msra.mxu0 %v983_v62  ;;  %v3288_v22 = vpop.f32.mrf.mxu0  ;;  %v3319_v62 = vadd.f32 %v2251_v5, %v3295_v20 }
 0x1f6   :  { %v2188_v26 = vpop.f32.mrf.mxu1  ;;  %2439 = vmatprep.subr.mxu0 %v2691_v4 }
 0x1f7   :  { %v3297_v21 = vpop.f32.mrf.mxu0  ;;  %v2189_v30 = vadd.f32 %v2188_v26, %v2187_v18  ;;  %v2186_v18 = vadd.f32 %v3267_v15, %v3263_v13 }
 0x1f8   :  { %v2190_v36 = vpop.f32.mrf.mxu1 }
 0x1f9   :  { %2440 = vmatpush3.xpose.msra.mxu0 %v982_v34  ;;  %v3315_v56 = vpop.f32.mrf.mxu0  ;;  %v961_v26 = vadd.f32 %v2189_v30, %v3235_v54  ;;  %v956_v13 = vadd.f32 %v2186_v18, %v3235_v54 }
 0x1fa   :  { %v2191_v41 = vpop.f32.mrf.mxu1  ;;  %2441 = vmatprep.subr.mxu0 %v2691_v4 }
 0x1fb   :  { %v2192_v59 = vadd.f32 %v2191_v41, %v2190_v36  ;;  %v2270_v46 = vpop.f32.mrf.mxu0  ;;  %v3334_v36 = vadd.f32 %v2245_v12, %v3295_v20  ;;  %v991_v15 = vmax.f32 %v961_v26, 0.0  ;;  %v2266_v12 = vadd.f32 %v3288_v22, %v3282_v39 }
 0x1fc   :  { %v2193_v43 = vpop.f32.mrf.mxu1  ;;  %v2260_v22 = vadd.f32 %v3270_v16, %v3265_v14 }
 0x1fd   :  { %2442 = vmatpush3.xpose.msra.mxu0 %v981_v49  ;;  %v966_v32 = vadd.f32 %v2192_v59, %v3235_v54  ;;  %v2271_v37 = vpop.f32.mrf.mxu0  ;;  %v990_v49 = vmax.f32 %v956_v13, 0.0 }
 0x1fe   :  { %v2194_v52 = vpop.f32.mrf.mxu1  ;;  %2443 = vmatprep.subr.mxu0 %v2691_v4  ;;  %v3434_v14 = vadd.f32 %v2260_v22, %v3295_v20 }
 0x1ff   :  { %v2195_v47 = vadd.f32 %v2194_v52, %v2193_v43  ;;  %v992_v41 = vmax.f32 %v966_v32, 0.0  ;;  %v2273_v24 = vpop.f32.mrf.mxu0  ;;  %v2177_v52 = vadd.f32 %v3242_v58, %v3237_v55 }
 0x200   :  { %v2196_v45 = vpop.f32.mrf.mxu1 }
 0x201   :  { %2444 = vmatpush3.xpose.msra.mxu0 %v980_v53  ;;  %v971_v17 = vadd.f32 %v2195_v47, %v3235_v54  ;;  %v2274_v44 = vpop.f32.mrf.mxu0  ;;  %v989_v53 = vmax.f32 %v951_v8, 0.0  ;;  %v941_v2 = vadd.f32 %v2177_v52, %v3235_v54 }
 0x202   :  { %v2197_v61 = vpop.f32.mrf.mxu1  ;;  %2445 = vmatprep.subr.mxu0 %v2691_v4 }
 0x203   :  { %v2198_v48 = vadd.f32 %v2197_v61, %v2196_v45  ;;  %v993_v34 = vmax.f32 %v971_v17, 0.0  ;;  %v2276_v43 = vpop.f32.mrf.mxu0  ;;  %v988_v45 = vmax.f32 %v946_v23, 0.0  ;;  %v987_v61 = vmax.f32 %v941_v2, 0.0 }
 0x205   :  { %v976_v9 = vadd.f32 %v2198_v48, %v3235_v54  ;;  %2446 = vmatpush3.xpose.msra.mxu0 %v979_v63  ;;  %v2277_v0 = vpop.f32.mrf.mxu0  ;;  %v2275_v63 = vadd.f32 %v2274_v44, %v2273_v24  ;;  %v2272_v48 = vadd.f32 %v2271_v37, %v2270_v46  ;;  %v2269_v54 = vadd.f32 %v3315_v56, %v3297_v21 }
 0x206   :  { %2469 = vmatprep.subr.mxu0 %v2691_v4  ;;  %v2278_v60 = vadd.f32 %v2277_v0, %v2276_v43  ;;  %v2263_v56 = vadd.f32 %v3276_v28, %v3273_v19  ;;  %v2257_v28 = vadd.f32 %v3260_v10, %v3255_v7 }
 0x207   :  { %v994_v57 = vmax.f32 %v976_v9, 0.0  ;;  %v3396_v9 = vadd.f32 %v2275_v63, %v3295_v20  ;;  %v3402_v59 = vadd.f32 %v2272_v48, %v3295_v20 }
 0x208   :  { %2448 = vmatmul.mubr.f32.vlgmr.msra.gmra.mxu0 %v3305_v1  ;;  %v3388_v55 = vadd.f32 %v2278_v60, %v3295_v20  ;;  %v3429_v40 = vadd.f32 %v2263_v56, %v3295_v20  ;;  %v3441_v7 = vadd.f32 %v2257_v28, %v3295_v20 }
 0x209   :  { %2451 = vmatpush3.xpose.msra.mxu1 %v994_v57  ;;  %2470 = vmatpush3.msra.mxu0 %v3310_v11  ;;  %v3420_v57 = vadd.f32 %v2266_v12, %v3295_v20  ;;  %v1365_v12 = vstv %s1364_s5 }
 0x20a   :  { %2452 = vmatprep.subr.mxu1 %v2691_v4  ;;  %2471 = vmatprep.subr.mxu0 %v2691_v4 }
 0x20b   :  { %2472 = vmatpush3.msra.mxu0 %v3319_v62  ;;  %2485 = vmatprep.mubr.msk.f32.mxu0 %vm2692_vm1, %v2691_v4 }
 0x20c   :  { %2473 = vmatprep.subr.mxu0 %v2691_v4 }
 0x20d   :  { %2453 = vmatpush3.xpose.msra.mxu1 %v993_v34  ;;  %2474 = vmatpush3.msra.mxu0 %v3325_v51 }
 0x20e   :  { %2454 = vmatprep.subr.mxu1 %v2691_v4  ;;  %2475 = vmatprep.subr.mxu0 %v2691_v4 }
 0x20f   :  { %2476 = vmatpush3.msra.mxu0 %v3334_v36 }
 0x210   :  { %2477 = vmatprep.subr.mxu0 %v2691_v4 }
 0x211   :  { %2455 = vmatpush3.xpose.msra.mxu1 %v992_v41  ;;  %2478 = vmatpush3.msra.mxu0 %v3343_v33 }
 0x212   :  { %2456 = vmatprep.subr.mxu1 %v2691_v4  ;;  %2479 = vmatprep.subr.mxu0 %v2691_v4 }
 0x213   :  { %2480 = vmatpush3.msra.mxu0 %v3354_v27 }
 0x214   :  { %2481 = vmatprep.subr.mxu0 %v2691_v4 }
 0x215   :  { %2457 = vmatpush3.xpose.msra.mxu1 %v991_v15  ;;  %2482 = vmatpush3.msra.mxu0 %v3359_v29 }
 0x216   :  { %2458 = vmatprep.subr.mxu1 %v2691_v4  ;;  %2483 = vmatprep.subr.mxu0 %v2691_v4 }
 0x217   :  { %2484 = vmatpush3.msra.mxu0 %v3368_v38 }
 0x218   :  { %2507 = vmatprep.subr.mxu0 %v2691_v4 }
 0x219   :  { %2459 = vmatpush3.xpose.msra.mxu1 %v990_v49 }
 0x21a   :  { %2460 = vmatprep.subr.mxu1 %v2691_v4  ;;  %v2311_v47 = vpop.f32.mrf.mxu1 }
 0x21c   :  { %v2312_v58 = vpop.f32.mrf.mxu1 }
 0x21d   :  { %2461 = vmatpush3.xpose.msra.mxu1 %v989_v53  ;;  %v3391_v5 = vadd.f32 %v2312_v58, %v2311_v47 }
 0x21e   :  { %2462 = vmatprep.subr.mxu1 %v2691_v4  ;;  %v2314_v3 = vpop.f32.mrf.mxu1 }
 0x220   :  { %v2315_v17 = vpop.f32.mrf.mxu1 }
 0x221   :  { %2463 = vmatpush3.xpose.msra.mxu1 %v988_v45  ;;  %v3408_v21 = vadd.f32 %v2315_v17, %v2314_v3 }
 0x222   :  { %2464 = vmatprep.subr.mxu1 %v2691_v4  ;;  %v2317_v39 = vpop.f32.mrf.mxu1 }
 0x224   :  { %v2318_v50 = vpop.f32.mrf.mxu1 }
 0x225   :  { %2465 = vmatpush3.xpose.msra.mxu1 %v987_v61  ;;  %v3424_v19 = vadd.f32 %v2318_v50, %v2317_v39 }
 0x226   :  { %2488 = vmatprep.subr.mxu1 %v2691_v4  ;;  %v2320_v46 = vpop.f32.mrf.mxu1 }
 0x228   :  { %2467 = vmatmul.mubr.f32.vlgmr.msra.gmra.mxu1 %v3305_v1  ;;  %v3413_v1 = vadd.f32 %v2269_v54, %v3295_v20  ;;  %v2321_v16 = vpop.f32.mrf.mxu1 }
 0x229   :  { %2489 = vmatpush3.msra.mxu1 %v3388_v55  ;;  %2504 = vmatprep.mubr.msk.f32.mxu1 %vm2692_vm1, %v2691_v4  ;;  %v3438_v30 = vadd.f32 %v2321_v16, %v2320_v46 }
 0x22a   :  { %2490 = vmatprep.subr.mxu1 %v2691_v4  ;;  %v2323_v10 = vpop.f32.mrf.mxu1 }
 0x22b   :  { %2491 = vmatpush3.msra.mxu1 %v3396_v9 }
 0x22c   :  { %2492 = vmatprep.subr.mxu1 %v2691_v4  ;;  %v2324_v32 = vpop.f32.mrf.mxu1 }
 0x22d   :  { %2493 = vmatpush3.msra.mxu1 %v3402_v59  ;;  %v3447_v34 = vadd.f32 %v2324_v32, %v2323_v10 }
 0x22e   :  { %2494 = vmatprep.subr.mxu1 %v2691_v4  ;;  %v2326_v31 = vpop.f32.mrf.mxu1 }
 0x22f   :  { %2495 = vmatpush3.msra.mxu1 %v3413_v1 }
 0x230   :  { %2496 = vmatprep.subr.mxu1 %v2691_v4  ;;  %v2327_v35 = vpop.f32.mrf.mxu1 }
 0x231   :  { %2497 = vmatpush3.msra.mxu1 %v3420_v57  ;;  %v3451_v20 = vadd.f32 %v2327_v35, %v2326_v31  ;;  %v1514_v31 = vand.u32 127, %v137_v42 }
 0x232   :  { %2498 = vmatprep.subr.mxu1 %v2691_v4  ;;  %v2329_v37 = vpop.f32.mrf.mxu1 }
 0x233   :  { %2499 = vmatpush3.msra.mxu1 %v3429_v40 }
 0x234   :  { %2500 = vmatprep.subr.mxu1 %v2691_v4  ;;  %v2330_v18 = vpop.f32.mrf.mxu1 }
 0x235   :  { %2501 = vmatpush3.msra.mxu1 %v3434_v14  ;;  %v3453_v26 = vadd.f32 %v2330_v18, %v2329_v37 }
 0x236   :  { %2502 = vmatprep.subr.mxu1 %v2691_v4  ;;  %v2332_v41 = vpop.f32.mrf.mxu1 }
 0x237   :  { %2503 = vmatpush3.msra.mxu1 %v3441_v7 }
 0x238   :  { %2526 = vmatprep.subr.mxu1 %v2691_v4  ;;  %v2333_v24 = vpop.f32.mrf.mxu1 }
 0x239   :  { %v3455_v25 = vadd.f32 %v2333_v24, %v2332_v41 }
 0x23a   :  { %v2335_v13 = vpop.f32.mrf.mxu1 }
 0x23c   :  { %v2336_v15 = vpop.f32.mrf.mxu1 }
 0x23d   :  { %v3457_v44 = vadd.f32 %v2336_v15, %v2335_v13 }
 0x23e   :  { %v2338_v6 = vpop.f32.mrf.mxu1 }
 0x240   :  { %v2339_v8 = vpop.f32.mrf.mxu1 }
 0x241   :  { %v3459_v49 = vadd.f32 %v2339_v8, %v2338_v6 }
 0x242   :  { %v2341_v43 = vpop.f32.mrf.mxu1 }
 0x244   :  { %v2342_v52 = vpop.f32.mrf.mxu1 }
 0x245   :  { %v3461_v23 = vadd.f32 %v2342_v52, %v2341_v43 }
 0x246   :  { %v2344_v53 = vpop.f32.mrf.mxu1 }
 0x248   :  { %v2345_v0 = vpop.f32.mrf.mxu1 }
 0x249   :  { %v3463_v2 = vadd.f32 %v2345_v0, %v2344_v53 }
 0x24a   :  { %v2347_v45 = vpop.f32.mrf.mxu1 }
 0x24c   :  { %v2348_v60 = vpop.f32.mrf.mxu1 }
 0x24d   :  { %v3465_v61 = vadd.f32 %v2348_v60, %v2347_v45 }
 0x24e   :  { %v2350_v63 = vpop.f32.mrf.mxu1 }
 0x250   :  { %v2351_v47 = vpop.f32.mrf.mxu1 }
 0x251   :  { %v3467_v48 = vadd.f32 %v2351_v47, %v2350_v63 }
 0x252   :  { %v2353_v58 = vpop.f32.mrf.mxu1 }
 0x254   :  { %v2354_v54 = vpop.f32.mrf.mxu1 }
 0x255   :  { %v3469_v3 = vadd.f32 %v2354_v54, %v2353_v58 }
 0x256   :  { %v3472_v50 = vpop.f32.mrf.mxu1 }
 0x258   :  { %v3474_v28 = vpop.f32.mrf.mxu1 }
 0x2c8   :  { %v1432_v17 = vpop.f32.mrf.mxu0 }
 0x2c9   :  { %v1433_v56 = vadd.f32 %v1432_v17, %v1365_v12 }
 0x2ca   :  { %v2449_v39 = vpop.f32.mrf.mxu0 }
 0x2cb   :  { %v1507_v22 = vsel %vm1506_vm2, %v1433_v56, -inf }
 0x2cc   :  { %1508 = vmax.xlane.f32.xlu0 %v1507_v22 }
 0x2e8   :  { %v1502_v46 = vpop.f32.mrf.mxu1 }
 0x2e9   :  { %v1503_v16 = vadd.f32 %v1502_v46, %v1365_v12 }
 0x2ea   :  { %v2468_v10 = vpop.f32.mrf.mxu1 }
 0x2eb   :  { %v1510_v32 = vsel %vm1506_vm2, %v1503_v16, -inf }
 0x2ec   :  { %1511 = vmax.xlane.f32.xlu0 %v1510_v32 }
 0x355   :  { %v3478_v35 = vpop.xlane.xlu0 %1508 }
 0x356   :  { %vm1515_vm3 = vcmp.eq.f32.partialorder %v1433_v56, %v3478_v35 }
 0x357   :  { %v1517_v37 = vsel %vm1515_vm3, %v1514_v31, 64 }
 0x358   :  { %v1519_v18 = vsel %vm1506_vm2, %v1517_v37, 2147483647 }
 0x359   :  { %v1521_v41 = vshra.s32 %v1519_v18, 16  ;;  %v1520_v42 = vand.u32 65535, %v1519_v18 }
 0x35b   :  { %v1523_v24 = vcvt.s32.f32 %v1521_v41  ;;  %v1522_v53 = vcvt.s32.f32 %v1520_v42 }
 0x35d   :  { %1524 = vmin.xlane.f32.xlu1 %v1523_v24 }
 0x375   :  { %v3482_v13 = vpop.xlane.xlu0 %1511 }
 0x376   :  { %vm1516_vm4 = vcmp.eq.f32.partialorder %v1503_v16, %v3482_v13 }
 0x377   :  { %v1518_v15 = vsel %vm1516_vm4, %v1514_v31, 64 }
 0x378   :  { %v1534_v6 = vsel %vm1506_vm2, %v1518_v15, 2147483647 }
 0x379   :  { %v1536_v8 = vshra.s32 %v1534_v6, 16  ;;  %v1535_v45 = vand.u32 65535, %v1534_v6 }
 0x37b   :  { %v1538_v43 = vcvt.s32.f32 %v1536_v8  ;;  %v1537_v63 = vcvt.s32.f32 %v1535_v45 }
 0x37d   :  { %1539 = vmin.xlane.f32.xlu1 %v1538_v43 }
 0x3e6   :  { %v1525_v52 = vpop.xlane.xlu1 %1524 }
 0x3e7   :  { %vm1526_vm5 = vcmp.eq.f32.partialorder %v1523_v24, %v1525_v52  ;;  %v1531_v58 = vcvt.f32.s32 %v1525_v52 }
 0x3e8   :  { %v1527_v0 = vsel %vm1526_vm5, %v1522_v53, inf  ;;  %v2010_v53 = vld [vmem:[%s3591_s10] sm:$0x1] }
 0x3e9   :  { %1528 = vmin.xlane.f32.xlu0 %v1527_v0  ;;  %v1532_v12 = vshll.u32 %v1531_v58, 16 }
 0x406   :  { %v1540_v60 = vpop.xlane.xlu1 %1539 }
 0x407   :  { %vm1541_vm6 = vcmp.eq.f32.partialorder %v1538_v43, %v1540_v60 }
 0x408   :  { %v1542_v47 = vsel %vm1541_vm6, %v1537_v63, inf }
 0x409   :  { %1543 = vmin.xlane.f32.xlu1 %v1542_v47 }
 0x472   :  { %v1529_v54 = vpop.xlane.xlu0 %1528 }
 0x473   :  { %v1530_v17 = vcvt.f32.s32 %v1529_v54 }
 0x475   :  { %v1533_v56 = vadd.s32 %v1532_v12, %v1530_v17  ;;  %v2021_v17 = vstv %s2115_s0 }
 0x477   :  { %vm1549_vm8 = vcmp.eq.s32.totalorder %v1514_v31, %v1533_v56  ;;  %v2025_v56 = vstv %s2116_s3 }
 0x478   :  { %v2109_v39 = vsel %vm1549_vm8, 1.0, %v2691_v4 }
 0x479   :  { %2486 = vmatmul.mubr.msk.f32.vlgmr.msra.gmra.mxu0 %vm1555_vm7, %v2109_v39  ;;  %v2029_v39 = vstv %s2117_s11 }
 0x47a   :  { %2508 = vmatpush3.xpose.msra.mxu0 %v3310_v11  ;;  %2523 = vmatprep.mubr.msk.f32.mxu0 %vm2692_vm1, %v2691_v4  ;;  %v1546_v11 = vcvt.f32.s32 %v1540_v60 }
 0x47b   :  { %2509 = vmatprep.subr.mxu0 %v2691_v4 }
 0x47c   :  { %v1547_v22 = vshll.u32 %v1546_v11, 16 }
 0x47e   :  { %2510 = vmatpush3.xpose.msra.mxu0 %v3319_v62 }
 0x47f   :  { %2511 = vmatprep.subr.mxu0 %v2691_v4 }
 0x482   :  { %2512 = vmatpush3.xpose.msra.mxu0 %v3325_v51 }
 0x483   :  { %2513 = vmatprep.subr.mxu0 %v2691_v4 }
 0x486   :  { %2514 = vmatpush3.xpose.msra.mxu0 %v3334_v36 }
 0x487   :  { %2515 = vmatprep.subr.mxu0 %v2691_v4 }
 0x48a   :  { %2516 = vmatpush3.xpose.msra.mxu0 %v3343_v33  ;;  %v2108_v33 = vld [vmem:[%s3590_s9] ss:$0 sm:$0xff] }
 0x48b   :  { %2517 = vmatprep.subr.mxu0 %v2691_v4 }
 0x48e   :  { %2518 = vmatpush3.xpose.msra.mxu0 %v3354_v27  ;;  %v1320_v27 = vadd.f32 %v3455_v25, %v2108_v33  ;;  %v1335_v25 = vadd.f32 %v3461_v23, %v2108_v33 }
 0x48f   :  { %2519 = vmatprep.subr.mxu0 %v2691_v4 }
 0x492   :  { %2520 = vmatpush3.xpose.msra.mxu0 %v3359_v29  ;;  %v1544_v62 = vpop.xlane.xlu1 %1543 }
 0x493   :  { %v1545_v51 = vcvt.f32.s32 %v1544_v62  ;;  %2521 = vmatprep.subr.mxu0 %v2691_v4 }
 0x495   :  { %v1548_v46 = vadd.s32 %v1547_v22, %v1545_v51  ;;  %v2026_v22 = vmul.f32 %v2025_v56, %v3478_v35 }
 0x496   :  { %2522 = vmatpush3.xpose.msra.mxu0 %v3368_v38  ;;  %v1315_v38 = vadd.f32 %v3453_v26, %v2108_v33  ;;  %v1340_v26 = vadd.f32 %v3463_v2, %v2108_v33 }
 0x497   :  { %vm1550_vm9 = vcmp.eq.s32.totalorder %v1514_v31, %v1548_v46  ;;  %2545 = vmatprep.subr.mxu0 %v2691_v4  ;;  %v2035_v46 = vstv %s2118_s22 }
 0x498   :  { %v2110_v36 = vsel %vm1550_vm9, 1.0, %v2691_v4 }
 0x499   :  { %2505 = vmatmul.mubr.msk.f32.vlgmr.msra.gmra.mxu1 %vm1555_vm7, %v2110_v36 }
 0x49a   :  { %2527 = vmatpush3.xpose.msra.mxu1 %v3388_v55  ;;  %2542 = vmatprep.mubr.msk.f32.mxu1 %vm2692_vm1, %v2691_v4 }
 0x49b   :  { %2528 = vmatprep.subr.mxu1 %v2691_v4 }
 0x49e   :  { %2529 = vmatpush3.xpose.msra.mxu1 %v3396_v9  ;;  %v1310_v9 = vadd.f32 %v3451_v20, %v2108_v33 }
 0x49f   :  { %2530 = vmatprep.subr.mxu1 %v2691_v4 }
 0x4a2   :  { %2531 = vmatpush3.xpose.msra.mxu1 %v3402_v59  ;;  %v1305_v59 = vadd.f32 %v3447_v34, %v2108_v33 }
 0x4a3   :  { %2532 = vmatprep.subr.mxu1 %v2691_v4 }
 0x4a6   :  { %2533 = vmatpush3.xpose.msra.mxu1 %v3413_v1  ;;  %v1300_v1 = vadd.f32 %v3438_v30, %v2108_v33  ;;  %v2358_v30 = vadd.f32 %v3474_v28, %v3472_v50 }
 0x4a7   :  { %2534 = vmatprep.subr.mxu1 %v2691_v4 }
 0x4aa   :  { %2535 = vmatpush3.xpose.msra.mxu1 %v3420_v57  ;;  %v1295_v57 = vadd.f32 %v3424_v19, %v2108_v33  ;;  %v1355_v19 = vadd.f32 %v3469_v3, %v2108_v33 }
 0x4ab   :  { %2536 = vmatprep.subr.mxu1 %v2691_v4 }
 0x4ae   :  { %2537 = vmatpush3.xpose.msra.mxu1 %v3429_v40  ;;  %v1290_v40 = vadd.f32 %v3408_v21, %v2108_v33  ;;  %v1345_v21 = vadd.f32 %v3465_v61, %v2108_v33  ;;  %v1325_v61 = vadd.f32 %v3457_v44, %v2108_v33 }
 0x4af   :  { %2538 = vmatprep.subr.mxu1 %v2691_v4 }
 0x4b2   :  { %2539 = vmatpush3.xpose.msra.mxu1 %v3434_v14  ;;  %v1285_v14 = vadd.f32 %v3391_v5, %v2108_v33  ;;  %v1350_v5 = vadd.f32 %v3467_v48, %v2108_v33  ;;  %v1330_v48 = vadd.f32 %v3459_v49, %v2108_v33 }
 0x4b3   :  { %2540 = vmatprep.subr.mxu1 %v2691_v4 }
 0x4b6   :  { %2541 = vmatpush3.xpose.msra.mxu1 %v3441_v7  ;;  %v1360_v7 = vadd.f32 %v2358_v30, %v2108_v33 }
 0x4b7   :  { %2564 = vmatprep.subr.mxu1 %v2691_v4 }
 0x539   :  { %v1625_v29 = vpop.f32.mrf.mxu0 }
 0x53a   :  { %2524 = vmatmul.mubr.f32.vlgmr.msra.gmra.mxu0 %v1625_v29 }
 0x53b   :  { %2546 = vmatpush3.msra.mxu0 %v1320_v27  ;;  %v2487_v55 = vpop.f32.mrf.mxu0  ;;  %2561 = vmatprep.mubr.msk.f32.mxu0 %vm2692_vm1, %v2691_v4 }
 0x53c   :  { %2547 = vmatprep.subr.mxu0 %v2691_v4 }
 0x53d   :  { %2548 = vmatpush3.msra.mxu0 %v1315_v38 }
 0x53e   :  { %2549 = vmatprep.subr.mxu0 %v2691_v4 }
 0x53f   :  { %2550 = vmatpush3.msra.mxu0 %v1310_v9 }
 0x540   :  { %2551 = vmatprep.subr.mxu0 %v2691_v4 }
 0x541   :  { %2552 = vmatpush3.msra.mxu0 %v1305_v59 }
 0x542   :  { %2553 = vmatprep.subr.mxu0 %v2691_v4 }
 0x543   :  { %2554 = vmatpush3.msra.mxu0 %v1300_v1  ;;  %v2027_v1 = vmul.f32 %v2025_v56, %v3482_v13 }
 0x544   :  { %2555 = vmatprep.subr.mxu0 %v2691_v4 }
 0x545   :  { %2556 = vmatpush3.msra.mxu0 %v1295_v57 }
 0x546   :  { %2557 = vmatprep.subr.mxu0 %v2691_v4 }
 0x547   :  { %2558 = vmatpush3.msra.mxu0 %v1290_v40 }
 0x548   :  { %2559 = vmatprep.subr.mxu0 %v2691_v4 }
 0x549   :  { %2560 = vmatpush3.msra.mxu0 %v1285_v14 }
 0x559   :  { %v1698_v34 = vpop.f32.mrf.mxu1 }
 0x55a   :  { %2543 = vmatmul.mubr.f32.vlgmr.msra.gmra.mxu1 %v1698_v34 }
 0x55b   :  { %2565 = vmatpush3.msra.mxu1 %v1360_v7  ;;  %v2506_v20 = vpop.f32.mrf.mxu1  ;;  %2580 = vmatprep.mubr.msk.f32.mxu1 %vm2692_vm1, %v2691_v4 }
 0x55c   :  { %2566 = vmatprep.subr.mxu1 %v2691_v4 }
 0x55d   :  { %2567 = vmatpush3.msra.mxu1 %v1355_v19 }
 0x55e   :  { %2568 = vmatprep.subr.mxu1 %v2691_v4 }
 0x55f   :  { %2569 = vmatpush3.msra.mxu1 %v1350_v5 }
 0x560   :  { %2570 = vmatprep.subr.mxu1 %v2691_v4 }
 0x561   :  { %2571 = vmatpush3.msra.mxu1 %v1345_v21 }
 0x562   :  { %2572 = vmatprep.subr.mxu1 %v2691_v4 }
 0x563   :  { %2573 = vmatpush3.msra.mxu1 %v1340_v26 }
 0x564   :  { %2574 = vmatprep.subr.mxu1 %v2691_v4 }
 0x565   :  { %2575 = vmatpush3.msra.mxu1 %v1335_v25 }
 0x566   :  { %2576 = vmatprep.subr.mxu1 %v2691_v4 }
 0x567   :  { %2577 = vmatpush3.msra.mxu1 %v1330_v48 }
 0x568   :  { %2578 = vmatprep.subr.mxu1 %v2691_v4 }
 0x569   :  { %2579 = vmatpush3.msra.mxu1 %v1325_v61 }
 0x5fa   :  { %v1768_v2 = vpop.f32.mrf.mxu0 }
 0x5fb   :  { %v1842_v3 = vsel %vm1506_vm2, %v1768_v2, -inf }
 0x5fc   :  { %1843 = vmax.xlane.f32.xlu0 %v1842_v3  ;;  %v2525_v50 = vpop.f32.mrf.mxu0 }
 0x61a   :  { %v1838_v23 = vpop.f32.mrf.mxu1 }
 0x61b   :  { %v1845_v28 = vsel %vm1506_vm2, %v1838_v23, -inf }
 0x61c   :  { %1846 = vmax.xlane.f32.xlu1 %v1845_v28  ;;  %v2544_v16 = vpop.f32.mrf.mxu1 }
 0x685   :  { %v1844_v49 = vpop.xlane.xlu0 %1843 }
 0x686   :  { %v1848_v10 = vsub.f32 %v1768_v2, %v1844_v49 }
 0x688   :  { %v1850_v32 = vmul.f32 1.442695, %v1848_v10 }
 0x68a   :  { %2591 = vpow2.f32 %v1850_v32 }
 0x697   :  { %v2592_v31 = vpop.eup %2591 }
 0x698   :  { %v1854_v44 = vsel %vm1506_vm2, %v2592_v31, 0.0 }
 0x699   :  { %1855 = vadd.xlane.f32.xlu0 %v1854_v44 }
 0x6a5   :  { %v1847_v4 = vpop.xlane.xlu1 %1846 }
 0x6a6   :  { %v1849_v37 = vsub.f32 %v1838_v23, %v1847_v4 }
 0x6a8   :  { %v1852_v18 = vmul.f32 1.442695, %v1849_v37 }
 0x6aa   :  { %2593 = vpow2.f32 %v1852_v18 }
 0x6b7   :  { %v2594_v41 = vpop.eup %2593 }
 0x6b8   :  { %v1857_v24 = vsel %vm1506_vm2, %v2594_v41, 0.0 }
 0x6b9   :  { %1858 = vadd.xlane.f32.xlu1 %v1857_v24 }
 0x722   :  { %v1856_v15 = vpop.xlane.xlu0 %1855 }
 0x723   :  { %2595 = vrcp.f32 %v1856_v15 }
 0x730   :  { %v2596_v6 = vpop.eup %2595 }
 0x731   :  { %v1862_v8 = vmul.f32 %v2596_v6, %v2592_v31 }
 0x733   :  { %2562 = vmatmul.mubr.msk.f32.vlgmr.msra.gmra.mxu0 %vm1555_vm7, %v1862_v8 }
 0x742   :  { %v1859_v43 = vpop.xlane.xlu1 %1858 }
 0x743   :  { %2597 = vrcp.f32 %v1859_v43 }
 0x750   :  { %v2598_v42 = vpop.eup %2597 }
 0x751   :  { %v1863_v52 = vmul.f32 %v2598_v42, %v2594_v41 }
 0x753   :  { %2581 = vmatmul.mubr.msk.f32.vlgmr.msra.gmra.mxu1 %vm1555_vm7, %v1863_v52 }
 0x7f3   :  { %v1933_v0 = vpop.f32.mrf.mxu0 }
 0x7f4   :  { %v2011_v45 = vmul.f32 %v2010_v53, %v1933_v0 }
 0x7f5   :  { %v2563_v60 = vpop.f32.mrf.mxu0 }
 0x7f6   :  { %v2014_v63 = vsel %vm2013_vm10, %v2011_v45, 0.0 }
 0x7f7   :  { %2015 = vadd.xlane.f32.xlu0 %v2014_v63 }
 0x813   :  { %v2006_v47 = vpop.f32.mrf.mxu1 }
 0x814   :  { %v2012_v58 = vmul.f32 %v2010_v53, %v2006_v47 }
 0x815   :  { %v2582_v54 = vpop.f32.mrf.mxu1 }
 0x816   :  { %v2017_v12 = vsel %vm2013_vm10, %v2012_v58, 0.0 }
 0x817   :  { %2018 = vadd.xlane.f32.xlu1 %v2017_v12 }
 0x880   :  { %v2016_v11 = vpop.xlane.xlu0 %2015 }
 0x881   :  { %v2022_v62 = vadd.f32 %v2021_v17, %v2016_v11 }
 0x883   :  { %v2030_v51 = vmul.f32 %v2029_v39, %v2022_v62 }
 0x885   :  { %v2032_v36 = vadd.f32 %v2030_v51, %v2026_v22 }
 0x887   :  { %v2036_v33 = vadd.f32 %v2035_v46, %v2032_v36 }
 0x889   :  { %v2038_v27 = vsub.f32 0.0, %v2036_v33 }
 0x88b   :  { %v2040_v29 = vmul.f32 1.442695, %v2038_v27 }
 0x88d   :  { %2599 = vpow2.f32 %v2040_v29 }
 0x89a   :  { %v2600_v38 = vpop.eup %2599 }
 0x89b   :  { %v2044_v55 = vadd.f32 1.0, %v2600_v38 }
 0x89d   :  { %2601 = vrcp.f32 %v2044_v55 }
 0x8a0   :  { %v2019_v9 = vpop.xlane.xlu1 %2018 }
 0x8a1   :  { %v2023_v59 = vadd.f32 %v2021_v17, %v2019_v9 }
 0x8a3   :  { %v2031_v57 = vmul.f32 %v2029_v39, %v2023_v59 }
 0x8a5   :  { %v2033_v40 = vadd.f32 %v2031_v57, %v2027_v1 }
 0x8a7   :  { %v2037_v14 = vadd.f32 %v2035_v46, %v2033_v40 }
 0x8a9   :  { %v2039_v30 = vsub.f32 0.0, %v2037_v14 }
 0x8aa   :  { %v2602_v35 = vpop.eup %2601 }
 0x8ab   :  { %2049 = vst.msk [vmem:[%s3593_s12] sm:$0x1] %vm2048_vm11, %v2602_v35  ;;  %v2042_v7 = vmul.f32 1.442695, %v2039_v30 }
 0x8ad   :  { %2603 = vpow2.f32 %v2042_v7 }
 0x8ba   :  { %v2604_v34 = vpop.eup %2603 }
 0x8bb   :  { %v2045_v19 = vadd.f32 1.0, %v2604_v34 }
 0x8bd   :  { %2605 = vrcp.f32 %v2045_v19 }
 0x8ca   :  { %v2606_v20 = vpop.eup %2605 }
 0x8cb   :  { %2050 = vst.msk [vmem:[%s3593_s12 + $0x1] sm:$0x1] %vm2048_vm11, %v2606_v20 }
 0x8cc   :  { %2055 = vsyncpa [#allocation3], 1 }
 0x8cd   :  { %2056 = vsyncpa [#allocation6], 1 }
 0x8ce   :  { %2057 = vsyncpa [#allocation4], 1 }

</bundles_post_ra>
